<compile_context>
chip_gen: v6e
topology: v6e:2x2x1
jax: 0.10.0
libtpu: 0.0.40
codegen_flags: <defaults>
</compile_context>

<pallas_src>
import functools
from dataclasses import dataclass

import jax
import jax.numpy as jnp
from jax.experimental import pallas as pl
from jax.experimental.pallas import tpu as pltpu

# Matmul operand dtype.  f32 for exact parity with the PyTorch reference;
# switch to jnp.bfloat16 on v6e/v7x for MXU-native throughput at real sizes.
MATMUL_DTYPE = jnp.float32


# ----------------------------------------------------------------------------
# Shared math helpers (pure jnp; used inside the kernel and in the reference)
# ----------------------------------------------------------------------------
def _ln(x, g, b, eps):
    mean = jnp.mean(x, axis=-1, keepdims=True)
    c = x - mean
    var = jnp.mean(c * c, axis=-1, keepdims=True)
    return c * jax.lax.rsqrt(var + eps) * g + b


def _erf(x):
    # Abramowitz & Stegun 7.1.26 polynomial (|err| < 1.5e-7); uses only
    # abs/exp/where which lower cleanly in Mosaic (lax.erf has no TPU rule).
    ax = jnp.abs(x)
    t = 1.0 / (1.0 + 0.3275911 * ax)
    poly = ((((1.061405429 * t - 1.453152027) * t + 1.421413741) * t
             - 0.284496736) * t + 0.254829592) * t
    y = 1.0 - poly * jnp.exp(-ax * ax)
    return jnp.where(x >= 0.0, y, -y)


def _gelu(x):
    # exact-erf GELU (pytorch_pretrained_bert semantics)
    return 0.5 * x * (1.0 + _erf(x * 0.7071067811865476))


def _mm(a, b):
    return jnp.dot(a.astype(MATMUL_DTYPE), b.astype(MATMUL_DTYPE),
                   preferred_element_type=jnp.float32)


def _bmm(eq, a, b):
    return jnp.einsum(eq, a.astype(MATMUL_DTYPE), b.astype(MATMUL_DTYPE),
                      preferred_element_type=jnp.float32)


# ----------------------------------------------------------------------------
# The fused kernel: emb-LN prologue + all encoder layers + pooler/fc epilogue
# ----------------------------------------------------------------------------
def _student_bert_kernel(emb_ref, mask_ref, eg_ref, eb_ref,
                         qkv_w_ref, ao_w_ref, i_w_ref, o_w_ref, vec_ref,
                         pw_ref, pb_ref, fw_ref, fb_ref,
                         h_ref, pooled_ref, logits_ref,
                         *, batch, seq, hidden, inter, num_heads, eps):
    H, I = hidden, inter
    DH = H // num_heads
    M = batch * seq
    layer = pl.program_id(0)

    # ---- layer-0 prologue: fused embedding LayerNorm primes the carried act
    @pl.when(layer == 0)
    def _():
        h_ref[...] = _ln(emb_ref[...], eg_ref[...], eb_ref[...], eps)

    x = h_ref[...]                                  # (M, H) f32, VMEM-resident

    # ---- unpack the per-layer packed bias / LN-param slab (one DMA) ----
    vec = vec_ref[0]                                # (8, VEC_W)
    qkv_b = vec[0:1, :3 * H]
    ao_b = vec[1:2, :H]
    ln1_g = vec[2:3, :H]
    ln1_b = vec[3:4, :H]
    i_b = vec[4:5, :I]
    o_b = vec[5:6, :H]
    ln2_g = vec[6:7, :H]
    ln2_b = vec[7:8, :H]

    # ---- fused QKV projection: one (M,H)x(H,3H) matmul ----
    qkv = _mm(x, qkv_w_ref[0]) + qkv_b              # (M, 3H)

    # ---- attention: additive mask hoisted out of the head loop ----
    mask_b = ((1.0 - mask_ref[...]) * -10000.0)[:, None, :]   # (B, 1, S)
    scale = 1.0 / float(DH) ** 0.5

    attn = jnp.zeros((M, H), jnp.float32)
    for hd in range(num_heads):                     # static unroll (NH small)
        q = qkv[:, hd * DH:(hd + 1) * DH].reshape(batch, seq, DH)
        k = qkv[:, H + hd * DH:H + (hd + 1) * DH].reshape(batch, seq, DH)
        v = qkv[:, 2 * H + hd * DH:2 * H + (hd + 1) * DH].reshape(batch, seq, DH)
        s = _bmm("bqd,bkd->bqk", q, k) * scale + mask_b
        s = s - jnp.max(s, axis=-1, keepdims=True)
        p = jnp.exp(s)
        p = p / jnp.sum(p, axis=-1, keepdims=True)  # exact softmax (parity)
        ctx = _bmm("bqk,bkd->bqd", p, v).reshape(M, DH)
        # accumulate against the sublane-tile-aligned rows of the AO weight:
        # equivalent to concat(heads) @ W_ao but with no lane-concat relayout.
        attn = attn + _mm(ctx, ao_w_ref[0, hd * DH:(hd + 1) * DH, :])
    attn = attn + ao_b

    # ---- attention residual + LN, FFN (erf-GELU) + residual + LN ----
    h1 = _ln(attn + x, ln1_g, ln1_b, eps)
    ffn = _mm(_gelu(_mm(h1, i_w_ref[0]) + i_b), o_w_ref[0]) + o_b
    h2 = _ln(ffn + h1, ln2_g, ln2_b, eps)
    h_ref[...] = h2                                 # carried to next layer

    # ---- last-layer epilogue: pooler (dense+tanh on [CLS]) + fc classifier
    @pl.when(layer == pl.num_programs(0) - 1)
    def _():
        x_cls = h2.reshape(batch, seq, H)[:, 0, :]  # (B, H), aligned slice
        pooled = jnp.tanh(_mm(x_cls, pw_ref[...]) + pb_ref[...])
        pooled_ref[...] = pooled
        logits_ref[...] = _mm(pooled, fw_ref[...]) + fb_ref[...]


# ----------------------------------------------------------------------------
# Pallas wrapper: single launch for emb-LN + encoder + pooler + fc
# ----------------------------------------------------------------------------
def fused_bert_forward(emb, mask_f, params, cfg, *, batch, seq):
    H, I = cfg.hidden_size, cfg.intermediate_size
    L, NH, C = cfg.num_layers, cfg.num_heads, cfg.class_num
    M = batch * seq
    enc = params["enc"]
    vec_w = enc["vecs"].shape[-1]

    def const_spec(shape):
        # whole array, same block every layer step (fetched once)
        return pl.BlockSpec(shape, lambda l: (0,) * len(shape))

    def layer_spec(shape):
        # stacked (L, *shape); slab l each grid step (double-buffered by Pallas)
        return pl.BlockSpec((1,) + shape, lambda l: (l,) + (0,) * len(shape))

    grid_spec = pltpu.PrefetchScalarGridSpec(
        num_scalar_prefetch=0,
        grid=(L,),
        in_specs=[
            const_spec((M, H)),           # embedding sum (pre-LN)
            const_spec((batch, seq)),     # attention mask (float)
            const_spec((1, H)),           # emb LN gamma
            const_spec((1, H)),           # emb LN beta
            layer_spec((H, 3 * H)),       # fused QKV weight
            layer_spec((H, H)),           # attention output weight
            layer_spec((H, I)),           # FFN intermediate weight
            layer_spec((I, H)),           # FFN output weight
            layer_spec((8, vec_w)),       # packed biases / LN params
            const_spec((H, H)),           # pooler weight
            const_spec((1, H)),           # pooler bias
            const_spec((H, C)),           # fc weight
            const_spec((1, C)),           # fc bias
        ],
        out_specs=[
            # constant index across the layer axis -> activation stays resident
            # in VMEM for the whole encoder; written to HBM once at the end.
            pl.BlockSpec((M, H), lambda l: (0, 0)),       # sequence output
            pl.BlockSpec((batch, H), lambda l: (0, 0)),   # pooled output
            pl.BlockSpec((batch, C), lambda l: (0, 0)),   # logits
        ],
    )

    kernel = functools.partial(
        _student_bert_kernel, batch=batch, seq=seq, hidden=H, inter=I,
        num_heads=NH, eps=1e-12)

    seq_flat, pooled, logits = pl.pallas_call(
        kernel,
        out_shape=(jax.ShapeDtypeStruct((M, H), jnp.float32),
                   jax.ShapeDtypeStruct((batch, H), jnp.float32),
                   jax.ShapeDtypeStruct((batch, C), jnp.float32)),
        grid_spec=grid_spec,
        compiler_params=pltpu.CompilerParams(
            dimension_semantics=("arbitrary",)),   # layer axis is sequential
    )(emb, mask_f,
      params["emb_ln_g"], params["emb_ln_b"],
      enc["qkv_w"], enc["ao_w"], enc["i_w"], enc["o_w"], enc["vecs"],
      params["pooler_w"], params["pooler_b"], params["fc_w"], params["fc_b"])
    return seq_flat, pooled, logits


def student_bert_classifier_forward(params, cfg, text, token, mask):
    """Returns (logits, (sequence_output, pooled_output)) == (res, y)."""
    B, S = text.shape
    H = cfg.hidden_size

    # ---- BertEmbeddings: row gathers kept as plain-JAX glue ----
    # TODO(synk): embedding gathers (jnp.take) have no clean dense-tile Pallas
    # equivalent at this size; kept in XLA.
    we = jnp.take(params["word_emb"], text, axis=0)           # (B, S, H)
    pe = params["pos_emb"][:S][None, :, :]                    # (1, S, H)
    te = jnp.take(params["type_emb"], token, axis=0)          # (B, S, H)
    emb = (we + pe + te).reshape(B * S, H)
    mask_f = mask.astype(jnp.float32)                         # (B, S)

    seq_flat, pooled, logits = fused_bert_forward(
        emb, mask_f, params, cfg, batch=B, seq=S)

    sequence_output = seq_flat.reshape(B, S, H)               # y[0]
    return logits, (sequence_output, pooled)                  # (res, y)


# ----------------------------------------------------------------------------
# Model definition (synthetic, deterministic parameters)
# ----------------------------------------------------------------------------
@dataclass(frozen=True)
class StudentBertConfig:
    vocab_size: int = 100        # config.stu_vocab_size
    hidden_size: int = 32        # config.stu_hidden_size
    num_layers: int = 2          # config.stu_hidden_layers
    num_heads: int = 4           # hidden_size must be divisible by num_heads
    intermediate_size: int = 128  # 4 * hidden_size
    max_position: int = 64
    type_vocab_size: int = 2
    class_num: int = 3           # config.class_num


def init_params(key, cfg):
    H, I, L = cfg.hidden_size, cfg.intermediate_size, cfg.num_layers
    V, P, T, C = (cfg.vocab_size, cfg.max_position, cfg.type_vocab_size,
                  cfg.class_num)
    std = 0.05
    keys = iter(jax.random.split(key, 32))

    def nrm(shape):
        return std * jax.random.normal(next(keys), shape, jnp.float32)

    ones = lambda s: jnp.ones(s, jnp.float32)
    zeros = lambda s: jnp.zeros(s, jnp.float32)

    # Pack the 8 small per-layer vectors into one lane-padded (L, 8, VEC_W)
    # slab -> a single per-layer DMA instead of 8 tiny ones.
    vec_w = max(128, -(-max(3 * H, I) // 128) * 128)

    def pad_row(v):                                  # (L, n) -> (L, 1, vec_w)
        return jnp.pad(v, ((0, 0), (0, vec_w - v.shape[-1])))[:, None, :]

    vecs = jnp.concatenate([
        pad_row(nrm((L, 3 * H))),   # row 0: fused QKV bias
        pad_row(nrm((L, H))),       # row 1: attention output bias
        pad_row(ones((L, H))),      # row 2: attn LN gamma
        pad_row(zeros((L, H))),     # row 3: attn LN beta
        pad_row(nrm((L, I))),       # row 4: intermediate bias
        pad_row(nrm((L, H))),       # row 5: FFN output bias
        pad_row(ones((L, H))),      # row 6: out LN gamma
        pad_row(zeros((L, H))),     # row 7: out LN beta
    ], axis=1)

    return {
        "word_emb": nrm((V, H)),
        "pos_emb": nrm((P, H)),
        "type_emb": nrm((T, H)),
        "emb_ln_g": ones((1, H)),
        "emb_ln_b": zeros((1, H)),
        "pooler_w": nrm((H, H)),
        "pooler_b": nrm((1, H)),
        "fc_w": nrm((H, C)),
        "fc_b": nrm((1, C)),
        "enc": {
            "qkv_w": nrm((L, H, 3 * H)),
            "ao_w": nrm((L, H, H)),
            "i_w": nrm((L, H, I)),
            "o_w": nrm((L, I, H)),
            "vecs": vecs,
        },
    }


# ----------------------------------------------------------------------------
# Pure-JAX reference (for correctness check only)
# ----------------------------------------------------------------------------
def reference_forward(params, cfg, text, token, mask):
    HP = jax.lax.Precision.HIGHEST
    B, S = text.shape
    H, I, NH = cfg.hidden_size, cfg.intermediate_size, cfg.num_heads
    DH = H // NH
    we = jnp.take(params["word_emb"], text, axis=0)
    pe = params["pos_emb"][:S][None, :, :]
    te = jnp.take(params["type_emb"], token, axis=0)
    x = (we + pe + te).reshape(B * S, H)
    x = _ln(x, params["emb_ln_g"], params["emb_ln_b"], 1e-12)
    ext = ((1.0 - mask.astype(jnp.float32)) * -10000.0)[:, None, None, :]
    enc = params["enc"]
    for l in range(cfg.num_layers):
        vec = enc["vecs"][l]
        qkv_b, ao_b = vec[0, :3 * H], vec[1, :H]
        ln1_g, ln1_b = vec[2, :H], vec[3, :H]
        i_b, o_b = vec[4, :I], vec[5, :H]
        ln2_g, ln2_b = vec[6, :H], vec[7, :H]
        qkv = jnp.dot(x, enc["qkv_w"][l], precision=HP) + qkv_b
        q = qkv[:, :H].reshape(B, S, NH, DH).transpose(0, 2, 1, 3)
        k = qkv[:, H:2 * H].reshape(B, S, NH, DH).transpose(0, 2, 1, 3)
        v = qkv[:, 2 * H:].reshape(B, S, NH, DH).transpose(0, 2, 1, 3)
        s = jnp.einsum("bhqd,bhkd->bhqk", q, k, precision=HP) / (DH ** 0.5) + ext
        p = jax.nn.softmax(s, axis=-1)
        ctx = jnp.einsum("bhqk,bhkd->bhqd", p, v, precision=HP)
        ctx = ctx.transpose(0, 2, 1, 3).reshape(B * S, H)
        attn = jnp.dot(ctx, enc["ao_w"][l], precision=HP) + ao_b
        h1 = _ln(attn + x, ln1_g, ln1_b, 1e-12)
        inter = _gelu(jnp.dot(h1, enc["i_w"][l], precision=HP) + i_b)
        ffn = jnp.dot(inter, enc["o_w"][l], precision=HP) + o_b
        x = _ln(ffn + h1, ln2_g, ln2_b, 1e-12)
    seq_out = x.reshape(B, S, H)
    pooled = jnp.tanh(jnp.dot(seq_out[:, 0, :], params["pooler_w"],
                              precision=HP) + params["pooler_b"])
    logits = jnp.dot(pooled, params["fc_w"], precision=HP) + params["fc_b"]
    return logits, seq_out, pooled


# ----------------------------------------------------------------------------
# Demo
# ----------------------------------------------------------------------------
if __name__ == "__main__":
    cfg = StudentBertConfig()
    B, S = 2, 8

    root = jax.random.PRNGKey(0)
    pkey, dkey = jax.random.split(root)
    params = init_params(pkey, cfg)

    text = jax.random.randint(dkey, (B, S), 0, cfg.vocab_size, dtype=jnp.int32)
    token = jnp.zeros((B, S), jnp.int32).at[:, S // 2:].set(1)   # segment ids
    mask = jnp.ones((B, S), jnp.int32).at[1, 6:].set(0)          # pad 2 of row 1

    fwd = jax.jit(student_bert_classifier_forward, static_argnums=(1,))
    logits, (seq_out, pooled) = fwd(params, cfg, text, token, mask)
    jax.block_until_ready((logits, seq_out, pooled))

    assert logits.shape == (B, cfg.class_num)
    assert seq_out.shape == (B, S, cfg.hidden_size)
    assert pooled.shape == (B, cfg.hidden_size)
    assert bool(jnp.all(jnp.isfinite(logits)))
    assert bool(jnp.all(jnp.isfinite(seq_out)))
    assert bool(jnp.all(jnp.isfinite(pooled)))

    # sanity check against a pure-JAX reference (loose tolerance: matmul pass
    # precision inside the kernel may differ slightly from XLA HIGHEST)
    ref_logits, ref_seq, ref_pooled = reference_forward(params, cfg, text,
                                                        token, mask)
    assert bool(jnp.allclose(seq_out, ref_seq, atol=2e-2, rtol=2e-2))
    assert bool(jnp.allclose(pooled, ref_pooled, atol=2e-2, rtol=2e-2))
    assert bool(jnp.allclose(logits, ref_logits, atol=2e-2, rtol=2e-2))

    print("KERNEL_OK")
</pallas_src>

<mosaic_0001>
module attributes {stable_mosaic.version = 11 : i64} {
  func.func @_student_bert_kernel(%arg0: i32, %arg1: memref<16x32xf32, #tpu.memory_space<vmem>>, %arg2: memref<2x8xf32, #tpu.memory_space<vmem>>, %arg3: memref<1x32xf32, #tpu.memory_space<vmem>>, %arg4: memref<1x32xf32, #tpu.memory_space<vmem>>, %arg5: memref<1x32x96xf32, #tpu.memory_space<vmem>>, %arg6: memref<1x32x32xf32, #tpu.memory_space<vmem>>, %arg7: memref<1x32x128xf32, #tpu.memory_space<vmem>>, %arg8: memref<1x128x32xf32, #tpu.memory_space<vmem>>, %arg9: memref<1x8x128xf32, #tpu.memory_space<vmem>>, %arg10: memref<32x32xf32, #tpu.memory_space<vmem>>, %arg11: memref<1x32xf32, #tpu.memory_space<vmem>>, %arg12: memref<32x3xf32, #tpu.memory_space<vmem>>, %arg13: memref<1x3xf32, #tpu.memory_space<vmem>>, %arg14: memref<16x32xf32, #tpu.memory_space<vmem>>, %arg15: memref<2x32xf32, #tpu.memory_space<vmem>>, %arg16: memref<2x3xf32, #tpu.memory_space<vmem>>) attributes {dimension_semantics = [#tpu.dimension_semantics<arbitrary>], iteration_bounds = array<i64: 2>, scalar_prefetch = 0 : i64, scratch_operands = 0 : i64, tpu.core_type = #tpu.core_type<tc>, window_params = [{pipeline_mode = #tpu.pipeline_mode<synchronous>, transform_indices = @transform_0, window_bounds = array<i64: 16, 32>}, {pipeline_mode = #tpu.pipeline_mode<synchronous>, transform_indices = @transform_1, window_bounds = array<i64: 2, 8>}, {pipeline_mode = #tpu.pipeline_mode<synchronous>, transform_indices = @transform_2, window_bounds = array<i64: 1, 32>}, {pipeline_mode = #tpu.pipeline_mode<synchronous>, transform_indices = @transform_3, window_bounds = array<i64: 1, 32>}, {transform_indices = @transform_4, window_bounds = array<i64: 1, 32, 96>}, {transform_indices = @transform_5, window_bounds = array<i64: 1, 32, 32>}, {transform_indices = @transform_6, window_bounds = array<i64: 1, 32, 128>}, {transform_indices = @transform_7, window_bounds = array<i64: 1, 128, 32>}, {transform_indices = @transform_8, window_bounds = array<i64: 1, 8, 128>}, {pipeline_mode = #tpu.pipeline_mode<synchronous>, transform_indices = @transform_9, window_bounds = array<i64: 32, 32>}, {pipeline_mode = #tpu.pipeline_mode<synchronous>, transform_indices = @transform_10, window_bounds = array<i64: 1, 32>}, {pipeline_mode = #tpu.pipeline_mode<synchronous>, transform_indices = @transform_11, window_bounds = array<i64: 32, 3>}, {pipeline_mode = #tpu.pipeline_mode<synchronous>, transform_indices = @transform_12, window_bounds = array<i64: 1, 3>}, {pipeline_mode = #tpu.pipeline_mode<synchronous>, transform_indices = @transform_13, window_bounds = array<i64: 16, 32>}, {pipeline_mode = #tpu.pipeline_mode<synchronous>, transform_indices = @transform_14, window_bounds = array<i64: 2, 32>}, {pipeline_mode = #tpu.pipeline_mode<synchronous>, transform_indices = @transform_15, window_bounds = array<i64: 2, 3>}]} {
    %c0_i32 = arith.constant 0 : i32
    %0 = arith.cmpi eq, %arg0, %c0_i32 : i32
    %1 = arith.extui %0 : i1 to i32
    %c0_i32_0 = arith.constant 0 : i32
    %2 = arith.cmpi ne, %1, %c0_i32_0 : i32
    scf.if %2 {
      %c0_82 = arith.constant 0 : index
      %c0_83 = arith.constant 0 : index
      %228 = vector.load %arg1[%c0_82, %c0_83] : memref<16x32xf32, #tpu.memory_space<vmem>>, vector<16x32xf32>
      %c0_84 = arith.constant 0 : index
      %c0_85 = arith.constant 0 : index
      %229 = vector.load %arg3[%c0_84, %c0_85] : memref<1x32xf32, #tpu.memory_space<vmem>>, vector<1x32xf32>
      %c0_86 = arith.constant 0 : index
      %c0_87 = arith.constant 0 : index
      %230 = vector.load %arg4[%c0_86, %c0_87] : memref<1x32xf32, #tpu.memory_space<vmem>>, vector<1x32xf32>
      %cst_88 = arith.constant dense<0.000000e+00> : vector<16xf32>
      %231 = vector.multi_reduction <add>, %228, %cst_88 [1] : vector<16x32xf32> to vector<16xf32>
      %232 = vector.shape_cast %231 : vector<16xf32> to vector<16x1xf32>
      %cst_89 = arith.constant 3.200000e+01 : f32
      %233 = vector.broadcast %cst_89 : f32 to vector<16x1xf32>
      %234 = arith.divf %232, %233 : vector<16x1xf32>
      %235 = vector.broadcast %234 : vector<16x1xf32> to vector<16x32xf32>
      %236 = arith.subf %228, %235 : vector<16x32xf32>
      %237 = arith.mulf %236, %236 : vector<16x32xf32>
      %cst_90 = arith.constant dense<0.000000e+00> : vector<16xf32>
      %238 = vector.multi_reduction <add>, %237, %cst_90 [1] : vector<16x32xf32> to vector<16xf32>
      %239 = vector.shape_cast %238 : vector<16xf32> to vector<16x1xf32>
      %cst_91 = arith.constant 3.200000e+01 : f32
      %240 = vector.broadcast %cst_91 : f32 to vector<16x1xf32>
      %241 = arith.divf %239, %240 : vector<16x1xf32>
      %cst_92 = arith.constant 9.99999996E-13 : f32
      %242 = vector.broadcast %cst_92 : f32 to vector<16x1xf32>
      %243 = arith.addf %241, %242 : vector<16x1xf32>
      %244 = math.rsqrt %243 : vector<16x1xf32>
      %245 = vector.broadcast %244 : vector<16x1xf32> to vector<16x32xf32>
      %246 = arith.mulf %236, %245 : vector<16x32xf32>
      %247 = vector.broadcast %229 : vector<1x32xf32> to vector<16x32xf32>
      %248 = arith.mulf %246, %247 : vector<16x32xf32>
      %249 = vector.broadcast %230 : vector<1x32xf32> to vector<16x32xf32>
      %250 = arith.addf %248, %249 : vector<16x32xf32>
      %c0_93 = arith.constant 0 : index
      %c0_94 = arith.constant 0 : index
      %251 = vector.load %arg14[%c0_93, %c0_94] : memref<16x32xf32, #tpu.memory_space<vmem>>, vector<16x32xf32>
      tpu.vector_store %arg14[%c0_93, %c0_94], %250 {strides = array<i32>} : memref<16x32xf32, #tpu.memory_space<vmem>>, vector<16x32xf32>,
    } else {
    }
    %c0 = arith.constant 0 : index
    %c0_1 = arith.constant 0 : index
    %3 = vector.load %arg14[%c0, %c0_1] : memref<16x32xf32, #tpu.memory_space<vmem>>, vector<16x32xf32>
    %c0_2 = arith.constant 0 : index
    %c0_3 = arith.constant 0 : index
    %c0_4 = arith.constant 0 : index
    %4 = vector.load %arg9[%c0_2, %c0_3, %c0_4] : memref<1x8x128xf32, #tpu.memory_space<vmem>>, vector<1x8x128xf32>
    %5 = vector.shape_cast %4 : vector<1x8x128xf32> to vector<8x128xf32>
    %6 = vector.extract_strided_slice %5 {offsets = [0, 0], sizes = [1, 96], strides = [1, 1]} : vector<8x128xf32> to vector<1x96xf32>
    %7 = vector.extract_strided_slice %5 {offsets = [1, 0], sizes = [1, 32], strides = [1, 1]} : vector<8x128xf32> to vector<1x32xf32>
    %8 = vector.extract_strided_slice %5 {offsets = [2, 0], sizes = [1, 32], strides = [1, 1]} : vector<8x128xf32> to vector<1x32xf32>
    %9 = vector.extract_strided_slice %5 {offsets = [3, 0], sizes = [1, 32], strides = [1, 1]} : vector<8x128xf32> to vector<1x32xf32>
    %10 = vector.extract_strided_slice %5 {offsets = [4, 0], sizes = [1, 128], strides = [1, 1]} : vector<8x128xf32> to vector<1x128xf32>
    %11 = vector.extract_strided_slice %5 {offsets = [5, 0], sizes = [1, 32], strides = [1, 1]} : vector<8x128xf32> to vector<1x32xf32>
    %12 = vector.extract_strided_slice %5 {offsets = [6, 0], sizes = [1, 32], strides = [1, 1]} : vector<8x128xf32> to vector<1x32xf32>
    %13 = vector.extract_strided_slice %5 {offsets = [7, 0], sizes = [1, 32], strides = [1, 1]} : vector<8x128xf32> to vector<1x32xf32>
    %c0_5 = arith.constant 0 : index
    %c0_6 = arith.constant 0 : index
    %c0_7 = arith.constant 0 : index
    %14 = vector.load %arg5[%c0_5, %c0_6, %c0_7] : memref<1x32x96xf32, #tpu.memory_space<vmem>>, vector<1x32x96xf32>
    %15 = vector.shape_cast %14 : vector<1x32x96xf32> to vector<32x96xf32>
    %cst = arith.constant dense<0.000000e+00> : vector<16x96xf32>
    %16 = tpu.matmul %3, %15, %cst {dimension_numbers = #tpu.dot_dimension_numbers<[1], [0], [0], [1], [0, 0, 1, 1], [], []>} : vector<16x32xf32>, vector<32x96xf32>, vector<16x96xf32> -> vector<16x96xf32>
    %17 = vector.broadcast %6 : vector<1x96xf32> to vector<16x96xf32>
    %18 = arith.addf %16, %17 : vector<16x96xf32>
    %c0_8 = arith.constant 0 : index
    %c0_9 = arith.constant 0 : index
    %19 = vector.load %arg2[%c0_8, %c0_9] : memref<2x8xf32, #tpu.memory_space<vmem>>, vector<2x8xf32>
    %cst_10 = arith.constant 1.000000e+00 : f32
    %20 = vector.broadcast %cst_10 : f32 to vector<2x8xf32>
    %21 = arith.subf %20, %19 : vector<2x8xf32>
    %cst_11 = arith.constant -1.000000e+04 : f32
    %22 = vector.broadcast %cst_11 : f32 to vector<2x8xf32>
    %23 = arith.mulf %21, %22 : vector<2x8xf32>
    %24 = vector.shape_cast %23 : vector<2x8xf32> to vector<2x1x8xf32>
    %cst_12 = arith.constant 0.000000e+00 : f32
    %25 = vector.broadcast %cst_12 : f32 to vector<16x32xf32>
    %26 = vector.extract_strided_slice %18 {offsets = [0, 0], sizes = [16, 8], strides = [1, 1]} : vector<16x96xf32> to vector<16x8xf32>
    %27 = vector.shape_cast %26 : vector<16x8xf32> to vector<2x8x8xf32>
    %28 = vector.extract_strided_slice %18 {offsets = [0, 32], sizes = [16, 8], strides = [1, 1]} : vector<16x96xf32> to vector<16x8xf32>
    %29 = vector.shape_cast %28 : vector<16x8xf32> to vector<2x8x8xf32>
    %30 = vector.extract_strided_slice %18 {offsets = [0, 64], sizes = [16, 8], strides = [1, 1]} : vector<16x96xf32> to vector<16x8xf32>
    %31 = vector.shape_cast %30 : vector<16x8xf32> to vector<2x8x8xf32>
    "tpu.trace_start"() <{level = 10 : i32, message = "bqd,bkd->bqk"}> : () -> ()
    %cst_13 = arith.constant dense<0.000000e+00> : vector<2x8x8xf32>
    %32 = tpu.matmul %27, %29, %cst_13 {dimension_numbers = #tpu.dot_dimension_numbers<[2], [2], [1], [1], [0, 0, 0, 1, 1, 1], [0], [0]>} : vector<2x8x8xf32>, vector<2x8x8xf32>, vector<2x8x8xf32> -> vector<2x8x8xf32>
    "tpu.trace_stop"() : () -> ()
    %cst_14 = arith.constant 0.353553385 : f32
    %33 = vector.broadcast %cst_14 : f32 to vector<2x8x8xf32>
    %34 = arith.mulf %32, %33 : vector<2x8x8xf32>
    %35 = vector.broadcast %24 : vector<2x1x8xf32> to vector<2x8x8xf32>
    %36 = arith.addf %34, %35 : vector<2x8x8xf32>
    %cst_15 = arith.constant dense<0xFF800000> : vector<2x8xf32>
    %37 = vector.multi_reduction <maximumf>, %36, %cst_15 [2] : vector<2x8x8xf32> to vector<2x8xf32>
    %38 = vector.shape_cast %37 : vector<2x8xf32> to vector<2x8x1xf32>
    %39 = vector.broadcast %38 : vector<2x8x1xf32> to vector<2x8x8xf32>
    %40 = arith.subf %36, %39 : vector<2x8x8xf32>
    %41 = math.exp %40 : vector<2x8x8xf32>
    %cst_16 = arith.constant dense<0.000000e+00> : vector<2x8xf32>
    %42 = vector.multi_reduction <add>, %41, %cst_16 [2] : vector<2x8x8xf32> to vector<2x8xf32>
    %43 = vector.shape_cast %42 : vector<2x8xf32> to vector<2x8x1xf32>
    %44 = vector.broadcast %43 : vector<2x8x1xf32> to vector<2x8x8xf32>
    %45 = arith.divf %41, %44 : vector<2x8x8xf32>
    "tpu.trace_start"() <{level = 10 : i32, message = "bqk,bkd->bqd"}> : () -> ()
    %cst_17 = arith.constant dense<0.000000e+00> : vector<2x8x8xf32>
    %46 = tpu.matmul %45, %31, %cst_17 {dimension_numbers = #tpu.dot_dimension_numbers<[2], [1], [1], [2], [0, 0, 0, 1, 1, 2], [0], [0]>} : vector<2x8x8xf32>, vector<2x8x8xf32>, vector<2x8x8xf32> -> vector<2x8x8xf32>
    "tpu.trace_stop"() : () -> ()
    %47 = vector.shape_cast %46 : vector<2x8x8xf32> to vector<16x8xf32>
    %c0_18 = arith.constant 0 : index
    %c0_19 = arith.constant 0 : index
    %c0_20 = arith.constant 0 : index
    %48 = vector.load %arg6[%c0_18, %c0_19, %c0_20] : memref<1x32x32xf32, #tpu.memory_space<vmem>>, vector<1x8x32xf32>
    %49 = vector.shape_cast %48 : vector<1x8x32xf32> to vector<8x32xf32>
    %cst_21 = arith.constant dense<0.000000e+00> : vector<16x32xf32>
    %50 = tpu.matmul %47, %49, %cst_21 {dimension_numbers = #tpu.dot_dimension_numbers<[1], [0], [0], [1], [0, 0, 1, 1], [], []>} : vector<16x8xf32>, vector<8x32xf32>, vector<16x32xf32> -> vector<16x32xf32>
    %51 = arith.addf %25, %50 : vector<16x32xf32>
    %52 = vector.extract_strided_slice %18 {offsets = [0, 8], sizes = [16, 8], strides = [1, 1]} : vector<16x96xf32> to vector<16x8xf32>
    %53 = vector.shape_cast %52 : vector<16x8xf32> to vector<2x8x8xf32>
    %54 = vector.extract_strided_slice %18 {offsets = [0, 40], sizes = [16, 8], strides = [1, 1]} : vector<16x96xf32> to vector<16x8xf32>
    %55 = vector.shape_cast %54 : vector<16x8xf32> to vector<2x8x8xf32>
    %56 = vector.extract_strided_slice %18 {offsets = [0, 72], sizes = [16, 8], strides = [1, 1]} : vector<16x96xf32> to vector<16x8xf32>
    %57 = vector.shape_cast %56 : vector<16x8xf32> to vector<2x8x8xf32>
    "tpu.trace_start"() <{level = 10 : i32, message = "bqd,bkd->bqk"}> : () -> ()
    %cst_22 = arith.constant dense<0.000000e+00> : vector<2x8x8xf32>
    %58 = tpu.matmul %53, %55, %cst_22 {dimension_numbers = #tpu.dot_dimension_numbers<[2], [2], [1], [1], [0, 0, 0, 1, 1, 1], [0], [0]>} : vector<2x8x8xf32>, vector<2x8x8xf32>, vector<2x8x8xf32> -> vector<2x8x8xf32>
    "tpu.trace_stop"() : () -> ()
    %cst_23 = arith.constant 0.353553385 : f32
    %59 = vector.broadcast %cst_23 : f32 to vector<2x8x8xf32>
    %60 = arith.mulf %58, %59 : vector<2x8x8xf32>
    %61 = vector.broadcast %24 : vector<2x1x8xf32> to vector<2x8x8xf32>
    %62 = arith.addf %60, %61 : vector<2x8x8xf32>
    %cst_24 = arith.constant dense<0xFF800000> : vector<2x8xf32>
    %63 = vector.multi_reduction <maximumf>, %62, %cst_24 [2] : vector<2x8x8xf32> to vector<2x8xf32>
    %64 = vector.shape_cast %63 : vector<2x8xf32> to vector<2x8x1xf32>
    %65 = vector.broadcast %64 : vector<2x8x1xf32> to vector<2x8x8xf32>
    %66 = arith.subf %62, %65 : vector<2x8x8xf32>
    %67 = math.exp %66 : vector<2x8x8xf32>
    %cst_25 = arith.constant dense<0.000000e+00> : vector<2x8xf32>
    %68 = vector.multi_reduction <add>, %67, %cst_25 [2] : vector<2x8x8xf32> to vector<2x8xf32>
    %69 = vector.shape_cast %68 : vector<2x8xf32> to vector<2x8x1xf32>
    %70 = vector.broadcast %69 : vector<2x8x1xf32> to vector<2x8x8xf32>
    %71 = arith.divf %67, %70 : vector<2x8x8xf32>
    "tpu.trace_start"() <{level = 10 : i32, message = "bqk,bkd->bqd"}> : () -> ()
    %cst_26 = arith.constant dense<0.000000e+00> : vector<2x8x8xf32>
    %72 = tpu.matmul %71, %57, %cst_26 {dimension_numbers = #tpu.dot_dimension_numbers<[2], [1], [1], [2], [0, 0, 0, 1, 1, 2], [0], [0]>} : vector<2x8x8xf32>, vector<2x8x8xf32>, vector<2x8x8xf32> -> vector<2x8x8xf32>
    "tpu.trace_stop"() : () -> ()
    %73 = vector.shape_cast %72 : vector<2x8x8xf32> to vector<16x8xf32>
    %c0_27 = arith.constant 0 : index
    %c8 = arith.constant 8 : index
    %c0_28 = arith.constant 0 : index
    %74 = vector.load %arg6[%c0_27, %c8, %c0_28] : memref<1x32x32xf32, #tpu.memory_space<vmem>>, vector<1x8x32xf32>
    %75 = vector.shape_cast %74 : vector<1x8x32xf32> to vector<8x32xf32>
    %cst_29 = arith.constant dense<0.000000e+00> : vector<16x32xf32>
    %76 = tpu.matmul %73, %75, %cst_29 {dimension_numbers = #tpu.dot_dimension_numbers<[1], [0], [0], [1], [0, 0, 1, 1], [], []>} : vector<16x8xf32>, vector<8x32xf32>, vector<16x32xf32> -> vector<16x32xf32>
    %77 = arith.addf %51, %76 : vector<16x32xf32>
    %78 = vector.extract_strided_slice %18 {offsets = [0, 16], sizes = [16, 8], strides = [1, 1]} : vector<16x96xf32> to vector<16x8xf32>
    %79 = vector.shape_cast %78 : vector<16x8xf32> to vector<2x8x8xf32>
    %80 = vector.extract_strided_slice %18 {offsets = [0, 48], sizes = [16, 8], strides = [1, 1]} : vector<16x96xf32> to vector<16x8xf32>
    %81 = vector.shape_cast %80 : vector<16x8xf32> to vector<2x8x8xf32>
    %82 = vector.extract_strided_slice %18 {offsets = [0, 80], sizes = [16, 8], strides = [1, 1]} : vector<16x96xf32> to vector<16x8xf32>
    %83 = vector.shape_cast %82 : vector<16x8xf32> to vector<2x8x8xf32>
    "tpu.trace_start"() <{level = 10 : i32, message = "bqd,bkd->bqk"}> : () -> ()
    %cst_30 = arith.constant dense<0.000000e+00> : vector<2x8x8xf32>
    %84 = tpu.matmul %79, %81, %cst_30 {dimension_numbers = #tpu.dot_dimension_numbers<[2], [2], [1], [1], [0, 0, 0, 1, 1, 1], [0], [0]>} : vector<2x8x8xf32>, vector<2x8x8xf32>, vector<2x8x8xf32> -> vector<2x8x8xf32>
    "tpu.trace_stop"() : () -> ()
    %cst_31 = arith.constant 0.353553385 : f32
    %85 = vector.broadcast %cst_31 : f32 to vector<2x8x8xf32>
    %86 = arith.mulf %84, %85 : vector<2x8x8xf32>
    %87 = vector.broadcast %24 : vector<2x1x8xf32> to vector<2x8x8xf32>
    %88 = arith.addf %86, %87 : vector<2x8x8xf32>
    %cst_32 = arith.constant dense<0xFF800000> : vector<2x8xf32>
    %89 = vector.multi_reduction <maximumf>, %88, %cst_32 [2] : vector<2x8x8xf32> to vector<2x8xf32>
    %90 = vector.shape_cast %89 : vector<2x8xf32> to vector<2x8x1xf32>
    %91 = vector.broadcast %90 : vector<2x8x1xf32> to vector<2x8x8xf32>
    %92 = arith.subf %88, %91 : vector<2x8x8xf32>
    %93 = math.exp %92 : vector<2x8x8xf32>
    %cst_33 = arith.constant dense<0.000000e+00> : vector<2x8xf32>
    %94 = vector.multi_reduction <add>, %93, %cst_33 [2] : vector<2x8x8xf32> to vector<2x8xf32>
    %95 = vector.shape_cast %94 : vector<2x8xf32> to vector<2x8x1xf32>
    %96 = vector.broadcast %95 : vector<2x8x1xf32> to vector<2x8x8xf32>
    %97 = arith.divf %93, %96 : vector<2x8x8xf32>
    "tpu.trace_start"() <{level = 10 : i32, message = "bqk,bkd->bqd"}> : () -> ()
    %cst_34 = arith.constant dense<0.000000e+00> : vector<2x8x8xf32>
    %98 = tpu.matmul %97, %83, %cst_34 {dimension_numbers = #tpu.dot_dimension_numbers<[2], [1], [1], [2], [0, 0, 0, 1, 1, 2], [0], [0]>} : vector<2x8x8xf32>, vector<2x8x8xf32>, vector<2x8x8xf32> -> vector<2x8x8xf32>
    "tpu.trace_stop"() : () -> ()
    %99 = vector.shape_cast %98 : vector<2x8x8xf32> to vector<16x8xf32>
    %c0_35 = arith.constant 0 : index
    %c16 = arith.constant 16 : index
    %c0_36 = arith.constant 0 : index
    %100 = vector.load %arg6[%c0_35, %c16, %c0_36] : memref<1x32x32xf32, #tpu.memory_space<vmem>>, vector<1x8x32xf32>
    %101 = vector.shape_cast %100 : vector<1x8x32xf32> to vector<8x32xf32>
    %cst_37 = arith.constant dense<0.000000e+00> : vector<16x32xf32>
    %102 = tpu.matmul %99, %101, %cst_37 {dimension_numbers = #tpu.dot_dimension_numbers<[1], [0], [0], [1], [0, 0, 1, 1], [], []>} : vector<16x8xf32>, vector<8x32xf32>, vector<16x32xf32> -> vector<16x32xf32>
    %103 = arith.addf %77, %102 : vector<16x32xf32>
    %104 = vector.extract_strided_slice %18 {offsets = [0, 24], sizes = [16, 8], strides = [1, 1]} : vector<16x96xf32> to vector<16x8xf32>
    %105 = vector.shape_cast %104 : vector<16x8xf32> to vector<2x8x8xf32>
    %106 = vector.extract_strided_slice %18 {offsets = [0, 56], sizes = [16, 8], strides = [1, 1]} : vector<16x96xf32> to vector<16x8xf32>
    %107 = vector.shape_cast %106 : vector<16x8xf32> to vector<2x8x8xf32>
    %108 = vector.extract_strided_slice %18 {offsets = [0, 88], sizes = [16, 8], strides = [1, 1]} : vector<16x96xf32> to vector<16x8xf32>
    %109 = vector.shape_cast %108 : vector<16x8xf32> to vector<2x8x8xf32>
    "tpu.trace_start"() <{level = 10 : i32, message = "bqd,bkd->bqk"}> : () -> ()
    %cst_38 = arith.constant dense<0.000000e+00> : vector<2x8x8xf32>
    %110 = tpu.matmul %105, %107, %cst_38 {dimension_numbers = #tpu.dot_dimension_numbers<[2], [2], [1], [1], [0, 0, 0, 1, 1, 1], [0], [0]>} : vector<2x8x8xf32>, vector<2x8x8xf32>, vector<2x8x8xf32> -> vector<2x8x8xf32>
    "tpu.trace_stop"() : () -> ()
    %cst_39 = arith.constant 0.353553385 : f32
    %111 = vector.broadcast %cst_39 : f32 to vector<2x8x8xf32>
    %112 = arith.mulf %110, %111 : vector<2x8x8xf32>
    %113 = vector.broadcast %24 : vector<2x1x8xf32> to vector<2x8x8xf32>
    %114 = arith.addf %112, %113 : vector<2x8x8xf32>
    %cst_40 = arith.constant dense<0xFF800000> : vector<2x8xf32>
    %115 = vector.multi_reduction <maximumf>, %114, %cst_40 [2] : vector<2x8x8xf32> to vector<2x8xf32>
    %116 = vector.shape_cast %115 : vector<2x8xf32> to vector<2x8x1xf32>
    %117 = vector.broadcast %116 : vector<2x8x1xf32> to vector<2x8x8xf32>
    %118 = arith.subf %114, %117 : vector<2x8x8xf32>
    %119 = math.exp %118 : vector<2x8x8xf32>
    %cst_41 = arith.constant dense<0.000000e+00> : vector<2x8xf32>
    %120 = vector.multi_reduction <add>, %119, %cst_41 [2] : vector<2x8x8xf32> to vector<2x8xf32>
    %121 = vector.shape_cast %120 : vector<2x8xf32> to vector<2x8x1xf32>
    %122 = vector.broadcast %121 : vector<2x8x1xf32> to vector<2x8x8xf32>
    %123 = arith.divf %119, %122 : vector<2x8x8xf32>
    "tpu.trace_start"() <{level = 10 : i32, message = "bqk,bkd->bqd"}> : () -> ()
    %cst_42 = arith.constant dense<0.000000e+00> : vector<2x8x8xf32>
    %124 = tpu.matmul %123, %109, %cst_42 {dimension_numbers = #tpu.dot_dimension_numbers<[2], [1], [1], [2], [0, 0, 0, 1, 1, 2], [0], [0]>} : vector<2x8x8xf32>, vector<2x8x8xf32>, vector<2x8x8xf32> -> vector<2x8x8xf32>
    "tpu.trace_stop"() : () -> ()
    %125 = vector.shape_cast %124 : vector<2x8x8xf32> to vector<16x8xf32>
    %c0_43 = arith.constant 0 : index
    %c24 = arith.constant 24 : index
    %c0_44 = arith.constant 0 : index
    %126 = vector.load %arg6[%c0_43, %c24, %c0_44] : memref<1x32x32xf32, #tpu.memory_space<vmem>>, vector<1x8x32xf32>
    %127 = vector.shape_cast %126 : vector<1x8x32xf32> to vector<8x32xf32>
    %cst_45 = arith.constant dense<0.000000e+00> : vector<16x32xf32>
    %128 = tpu.matmul %125, %127, %cst_45 {dimension_numbers = #tpu.dot_dimension_numbers<[1], [0], [0], [1], [0, 0, 1, 1], [], []>} : vector<16x8xf32>, vector<8x32xf32>, vector<16x32xf32> -> vector<16x32xf32>
    %129 = arith.addf %103, %128 : vector<16x32xf32>
    %130 = vector.broadcast %7 : vector<1x32xf32> to vector<16x32xf32>
    %131 = arith.addf %129, %130 : vector<16x32xf32>
    %132 = arith.addf %131, %3 : vector<16x32xf32>
    %cst_46 = arith.constant dense<0.000000e+00> : vector<16xf32>
    %133 = vector.multi_reduction <add>, %132, %cst_46 [1] : vector<16x32xf32> to vector<16xf32>
    %134 = vector.shape_cast %133 : vector<16xf32> to vector<16x1xf32>
    %cst_47 = arith.constant 3.200000e+01 : f32
    %135 = vector.broadcast %cst_47 : f32 to vector<16x1xf32>
    %136 = arith.divf %134, %135 : vector<16x1xf32>
    %137 = vector.broadcast %136 : vector<16x1xf32> to vector<16x32xf32>
    %138 = arith.subf %132, %137 : vector<16x32xf32>
    %139 = arith.mulf %138, %138 : vector<16x32xf32>
    %cst_48 = arith.constant dense<0.000000e+00> : vector<16xf32>
    %140 = vector.multi_reduction <add>, %139, %cst_48 [1] : vector<16x32xf32> to vector<16xf32>
    %141 = vector.shape_cast %140 : vector<16xf32> to vector<16x1xf32>
    %cst_49 = arith.constant 3.200000e+01 : f32
    %142 = vector.broadcast %cst_49 : f32 to vector<16x1xf32>
    %143 = arith.divf %141, %142 : vector<16x1xf32>
    %cst_50 = arith.constant 9.99999996E-13 : f32
    %144 = vector.broadcast %cst_50 : f32 to vector<16x1xf32>
    %145 = arith.addf %143, %144 : vector<16x1xf32>
    %146 = math.rsqrt %145 : vector<16x1xf32>
    %147 = vector.broadcast %146 : vector<16x1xf32> to vector<16x32xf32>
    %148 = arith.mulf %138, %147 : vector<16x32xf32>
    %149 = vector.broadcast %8 : vector<1x32xf32> to vector<16x32xf32>
    %150 = arith.mulf %148, %149 : vector<16x32xf32>
    %151 = vector.broadcast %9 : vector<1x32xf32> to vector<16x32xf32>
    %152 = arith.addf %150, %151 : vector<16x32xf32>
    %c0_51 = arith.constant 0 : index
    %c0_52 = arith.constant 0 : index
    %c0_53 = arith.constant 0 : index
    %153 = vector.load %arg7[%c0_51, %c0_52, %c0_53] : memref<1x32x128xf32, #tpu.memory_space<vmem>>, vector<1x32x128xf32>
    %154 = vector.shape_cast %153 : vector<1x32x128xf32> to vector<32x128xf32>
    %cst_54 = arith.constant dense<0.000000e+00> : vector<16x128xf32>
    %155 = tpu.matmul %152, %154, %cst_54 {dimension_numbers = #tpu.dot_dimension_numbers<[1], [0], [0], [1], [0, 0, 1, 1], [], []>} : vector<16x32xf32>, vector<32x128xf32>, vector<16x128xf32> -> vector<16x128xf32>
    %156 = vector.broadcast %10 : vector<1x128xf32> to vector<16x128xf32>
    %157 = arith.addf %155, %156 : vector<16x128xf32>
    %cst_55 = arith.constant 5.000000e-01 : f32
    %158 = vector.broadcast %cst_55 : f32 to vector<16x128xf32>
    %159 = arith.mulf %158, %157 : vector<16x128xf32>
    %cst_56 = arith.constant 0.707106769 : f32
    %160 = vector.broadcast %cst_56 : f32 to vector<16x128xf32>
    %161 = arith.mulf %157, %160 : vector<16x128xf32>
    %162 = math.absf %161 : vector<16x128xf32>
    %cst_57 = arith.constant 0.327591091 : f32
    %163 = vector.broadcast %cst_57 : f32 to vector<16x128xf32>
    %164 = arith.mulf %163, %162 : vector<16x128xf32>
    %cst_58 = arith.constant 1.000000e+00 : f32
    %165 = vector.broadcast %cst_58 : f32 to vector<16x128xf32>
    %166 = arith.addf %165, %164 : vector<16x128xf32>
    %cst_59 = arith.constant 1.000000e+00 : f32
    %167 = vector.broadcast %cst_59 : f32 to vector<16x128xf32>
    %168 = arith.divf %167, %166 : vector<16x128xf32>
    %cst_60 = arith.constant 1.06140542 : f32
    %169 = vector.broadcast %cst_60 : f32 to vector<16x128xf32>
    %170 = arith.mulf %169, %168 : vector<16x128xf32>
    %cst_61 = arith.constant 1.45315206 : f32
    %171 = vector.broadcast %cst_61 : f32 to vector<16x128xf32>
    %172 = arith.subf %170, %171 : vector<16x128xf32>
    %173 = arith.mulf %172, %168 : vector<16x128xf32>
    %cst_62 = arith.constant 1.42141378 : f32
    %174 = vector.broadcast %cst_62 : f32 to vector<16x128xf32>
    %175 = arith.addf %173, %174 : vector<16x128xf32>
    %176 = arith.mulf %175, %168 : vector<16x128xf32>
    %cst_63 = arith.constant 0.284496725 : f32
    %177 = vector.broadcast %cst_63 : f32 to vector<16x128xf32>
    %178 = arith.subf %176, %177 : vector<16x128xf32>
    %179 = arith.mulf %178, %168 : vector<16x128xf32>
    %cst_64 = arith.constant 0.254829586 : f32
    %180 = vector.broadcast %cst_64 : f32 to vector<16x128xf32>
    %181 = arith.addf %179, %180 : vector<16x128xf32>
    %182 = arith.mulf %181, %168 : vector<16x128xf32>
    %cst_65 = arith.constant 0.000000e+00 : f32
    %183 = vector.broadcast %cst_65 : f32 to vector<16x128xf32>
    %184 = arith.subf %183, %162 : vector<16x128xf32>
    %185 = arith.mulf %184, %162 : vector<16x128xf32>
    %186 = math.exp %185 : vector<16x128xf32>
    %187 = arith.mulf %182, %186 : vector<16x128xf32>
    %cst_66 = arith.constant 1.000000e+00 : f32
    %188 = vector.broadcast %cst_66 : f32 to vector<16x128xf32>
    %189 = arith.subf %188, %187 : vector<16x128xf32>
    %cst_67 = arith.constant 0.000000e+00 : f32
    %190 = vector.broadcast %cst_67 : f32 to vector<16x128xf32>
    %191 = arith.cmpf oge, %161, %190 : vector<16x128xf32>
    %cst_68 = arith.constant 0.000000e+00 : f32
    %192 = vector.broadcast %cst_68 : f32 to vector<16x128xf32>
    %193 = arith.subf %192, %189 : vector<16x128xf32>
    %194 = arith.select %191, %189, %193 : vector<16x128xi1>, vector<16x128xf32>
    %cst_69 = arith.constant 1.000000e+00 : f32
    %195 = vector.broadcast %cst_69 : f32 to vector<16x128xf32>
    %196 = arith.addf %195, %194 : vector<16x128xf32>
    %197 = arith.mulf %159, %196 : vector<16x128xf32>
    %c0_70 = arith.constant 0 : index
    %c0_71 = arith.constant 0 : index
    %c0_72 = arith.constant 0 : index
    %198 = vector.load %arg8[%c0_70, %c0_71, %c0_72] : memref<1x128x32xf32, #tpu.memory_space<vmem>>, vector<1x128x32xf32>
    %199 = vector.shape_cast %198 : vector<1x128x32xf32> to vector<128x32xf32>
    %cst_73 = arith.constant dense<0.000000e+00> : vector<16x32xf32>
    %200 = tpu.matmul %197, %199, %cst_73 {dimension_numbers = #tpu.dot_dimension_numbers<[1], [0], [0], [1], [0, 0, 1, 1], [], []>} : vector<16x128xf32>, vector<128x32xf32>, vector<16x32xf32> -> vector<16x32xf32>
    %201 = vector.broadcast %11 : vector<1x32xf32> to vector<16x32xf32>
    %202 = arith.addf %200, %201 : vector<16x32xf32>
    %203 = arith.addf %202, %152 : vector<16x32xf32>
    %cst_74 = arith.constant dense<0.000000e+00> : vector<16xf32>
    %204 = vector.multi_reduction <add>, %203, %cst_74 [1] : vector<16x32xf32> to vector<16xf32>
    %205 = vector.shape_cast %204 : vector<16xf32> to vector<16x1xf32>
    %cst_75 = arith.constant 3.200000e+01 : f32
    %206 = vector.broadcast %cst_75 : f32 to vector<16x1xf32>
    %207 = arith.divf %205, %206 : vector<16x1xf32>
    %208 = vector.broadcast %207 : vector<16x1xf32> to vector<16x32xf32>
    %209 = arith.subf %203, %208 : vector<16x32xf32>
    %210 = arith.mulf %209, %209 : vector<16x32xf32>
    %cst_76 = arith.constant dense<0.000000e+00> : vector<16xf32>
    %211 = vector.multi_reduction <add>, %210, %cst_76 [1] : vector<16x32xf32> to vector<16xf32>
    %212 = vector.shape_cast %211 : vector<16xf32> to vector<16x1xf32>
    %cst_77 = arith.constant 3.200000e+01 : f32
    %213 = vector.broadcast %cst_77 : f32 to vector<16x1xf32>
    %214 = arith.divf %212, %213 : vector<16x1xf32>
    %cst_78 = arith.constant 9.99999996E-13 : f32
    %215 = vector.broadcast %cst_78 : f32 to vector<16x1xf32>
    %216 = arith.addf %214, %215 : vector<16x1xf32>
    %217 = math.rsqrt %216 : vector<16x1xf32>
    %218 = vector.broadcast %217 : vector<16x1xf32> to vector<16x32xf32>
    %219 = arith.mulf %209, %218 : vector<16x32xf32>
    %220 = vector.broadcast %12 : vector<1x32xf32> to vector<16x32xf32>
    %221 = arith.mulf %219, %220 : vector<16x32xf32>
    %222 = vector.broadcast %13 : vector<1x32xf32> to vector<16x32xf32>
    %223 = arith.addf %221, %222 : vector<16x32xf32>
    %c0_79 = arith.constant 0 : index
    %c0_80 = arith.constant 0 : index
    %224 = vector.load %arg14[%c0_79, %c0_80] : memref<16x32xf32, #tpu.memory_space<vmem>>, vector<16x32xf32>
    tpu.vector_store %arg14[%c0_79, %c0_80], %223 {strides = array<i32>} : memref<16x32xf32, #tpu.memory_space<vmem>>, vector<16x32xf32>,
    %c1_i32 = arith.constant 1 : i32
    %225 = arith.cmpi eq, %arg0, %c1_i32 : i32
    %226 = arith.extui %225 : i1 to i32
    %c0_i32_81 = arith.constant 0 : i32
    %227 = arith.cmpi ne, %226, %c0_i32_81 : i32
    scf.if %227 {
      %228 = vector.shape_cast %223 : vector<16x32xf32> to vector<2x8x32xf32>
      %229 = vector.extract_strided_slice %228 {offsets = [0, 0, 0], sizes = [2, 1, 32], strides = [1, 1, 1]} : vector<2x8x32xf32> to vector<2x1x32xf32>
      %230 = vector.shape_cast %229 : vector<2x1x32xf32> to vector<2x32xf32>
      %c0_82 = arith.constant 0 : index
      %c0_83 = arith.constant 0 : index
      %231 = vector.load %arg10[%c0_82, %c0_83] : memref<32x32xf32, #tpu.memory_space<vmem>>, vector<32x32xf32>
      %cst_84 = arith.constant dense<0.000000e+00> : vector<2x32xf32>
      %232 = tpu.matmul %230, %231, %cst_84 {dimension_numbers = #tpu.dot_dimension_numbers<[1], [0], [0], [1], [0, 0, 1, 1], [], []>} : vector<2x32xf32>, vector<32x32xf32>, vector<2x32xf32> -> vector<2x32xf32>
      %c0_85 = arith.constant 0 : index
      %c0_86 = arith.constant 0 : index
      %233 = vector.load %arg11[%c0_85, %c0_86] : memref<1x32xf32, #tpu.memory_space<vmem>>, vector<1x32xf32>
      %234 = vector.broadcast %233 : vector<1x32xf32> to vector<2x32xf32>
      %235 = arith.addf %232, %234 : vector<2x32xf32>
      %236 = math.tanh %235 : vector<2x32xf32>
      %c0_87 = arith.constant 0 : index
      %c0_88 = arith.constant 0 : index
      %237 = vector.load %arg15[%c0_87, %c0_88] : memref<2x32xf32, #tpu.memory_space<vmem>>, vector<2x32xf32>
      tpu.vector_store %arg15[%c0_87, %c0_88], %236 {strides = array<i32>} : memref<2x32xf32, #tpu.memory_space<vmem>>, vector<2x32xf32>,
      %c0_89 = arith.constant 0 : index
      %c0_90 = arith.constant 0 : index
      %238 = vector.load %arg12[%c0_89, %c0_90] : memref<32x3xf32, #tpu.memory_space<vmem>>, vector<32x3xf32>
      %cst_91 = arith.constant dense<0.000000e+00> : vector<2x3xf32>
      %239 = tpu.matmul %236, %238, %cst_91 {dimension_numbers = #tpu.dot_dimension_numbers<[1], [0], [0], [1], [0, 0, 1, 1], [], []>} : vector<2x32xf32>, vector<32x3xf32>, vector<2x3xf32> -> vector<2x3xf32>
      %c0_92 = arith.constant 0 : index
      %c0_93 = arith.constant 0 : index
      %240 = vector.load %arg13[%c0_92, %c0_93] : memref<1x3xf32, #tpu.memory_space<vmem>>, vector<1x3xf32>
      %241 = vector.broadcast %240 : vector<1x3xf32> to vector<2x3xf32>
      %242 = arith.addf %239, %241 : vector<2x3xf32>
      %c0_94 = arith.constant 0 : index
      %c0_95 = arith.constant 0 : index
      %243 = vector.load %arg16[%c0_94, %c0_95] : memref<2x3xf32, #tpu.memory_space<vmem>>, vector<2x3xf32>
      tpu.vector_store %arg16[%c0_94, %c0_95], %242 {strides = array<i32>} : memref<2x3xf32, #tpu.memory_space<vmem>>, vector<2x3xf32>,
    } else {
    }
    return
  }
  func.func @transform_0(%arg0: i32) -> (i32, i32) {
    %c0_i32 = arith.constant 0 : i32
    %c0_i32_0 = arith.constant 0 : i32
    %c0_i32_1 = arith.constant 0 : i32
    return %c0_i32, %c0_i32_0 : i32, i32
  }
  func.func @transform_1(%arg0: i32) -> (i32, i32) {
    %c0_i32 = arith.constant 0 : i32
    %c0_i32_0 = arith.constant 0 : i32
    %c0_i32_1 = arith.constant 0 : i32
    return %c0_i32, %c0_i32_0 : i32, i32
  }
  func.func @transform_2(%arg0: i32) -> (i32, i32) {
    %c0_i32 = arith.constant 0 : i32
    %c0_i32_0 = arith.constant 0 : i32
    %c0_i32_1 = arith.constant 0 : i32
    return %c0_i32, %c0_i32_0 : i32, i32
  }
  func.func @transform_3(%arg0: i32) -> (i32, i32) {
    %c0_i32 = arith.constant 0 : i32
    %c0_i32_0 = arith.constant 0 : i32
    %c0_i32_1 = arith.constant 0 : i32
    return %c0_i32, %c0_i32_0 : i32, i32
  }
  func.func @transform_4(%arg0: i32) -> (i32, i32, i32) {
    %c0_i32 = arith.constant 0 : i32
    %c0_i32_0 = arith.constant 0 : i32
    %c0_i32_1 = arith.constant 0 : i32
    return %arg0, %c0_i32, %c0_i32_0 : i32, i32, i32
  }
  func.func @transform_5(%arg0: i32) -> (i32, i32, i32) {
    %c0_i32 = arith.constant 0 : i32
    %c0_i32_0 = arith.constant 0 : i32
    %c0_i32_1 = arith.constant 0 : i32
    return %arg0, %c0_i32, %c0_i32_0 : i32, i32, i32
  }
  func.func @transform_6(%arg0: i32) -> (i32, i32, i32) {
    %c0_i32 = arith.constant 0 : i32
    %c0_i32_0 = arith.constant 0 : i32
    %c0_i32_1 = arith.constant 0 : i32
    return %arg0, %c0_i32, %c0_i32_0 : i32, i32, i32
  }
  func.func @transform_7(%arg0: i32) -> (i32, i32, i32) {
    %c0_i32 = arith.constant 0 : i32
    %c0_i32_0 = arith.constant 0 : i32
    %c0_i32_1 = arith.constant 0 : i32
    return %arg0, %c0_i32, %c0_i32_0 : i32, i32, i32
  }
  func.func @transform_8(%arg0: i32) -> (i32, i32, i32) {
    %c0_i32 = arith.constant 0 : i32
    %c0_i32_0 = arith.constant 0 : i32
    %c0_i32_1 = arith.constant 0 : i32
    return %arg0, %c0_i32, %c0_i32_0 : i32, i32, i32
  }
  func.func @transform_9(%arg0: i32) -> (i32, i32) {
    %c0_i32 = arith.constant 0 : i32
    %c0_i32_0 = arith.constant 0 : i32
    %c0_i32_1 = arith.constant 0 : i32
    return %c0_i32, %c0_i32_0 : i32, i32
  }
  func.func @transform_10(%arg0: i32) -> (i32, i32) {
    %c0_i32 = arith.constant 0 : i32
    %c0_i32_0 = arith.constant 0 : i32
    %c0_i32_1 = arith.constant 0 : i32
    return %c0_i32, %c0_i32_0 : i32, i32
  }
  func.func @transform_11(%arg0: i32) -> (i32, i32) {
    %c0_i32 = arith.constant 0 : i32
    %c0_i32_0 = arith.constant 0 : i32
    %c0_i32_1 = arith.constant 0 : i32
    return %c0_i32, %c0_i32_0 : i32, i32
  }
  func.func @transform_12(%arg0: i32) -> (i32, i32) {
    %c0_i32 = arith.constant 0 : i32
    %c0_i32_0 = arith.constant 0 : i32
    %c0_i32_1 = arith.constant 0 : i32
    return %c0_i32, %c0_i32_0 : i32, i32
  }
  func.func @transform_13(%arg0: i32) -> (i32, i32) {
    %c0_i32 = arith.constant 0 : i32
    %c0_i32_0 = arith.constant 0 : i32
    %c0_i32_1 = arith.constant 0 : i32
    return %c0_i32, %c0_i32_0 : i32, i32
  }
  func.func @transform_14(%arg0: i32) -> (i32, i32) {
    %c0_i32 = arith.constant 0 : i32
    %c0_i32_0 = arith.constant 0 : i32
    %c0_i32_1 = arith.constant 0 : i32
    return %c0_i32, %c0_i32_0 : i32, i32
  }
  func.func @transform_15(%arg0: i32) -> (i32, i32) {
    %c0_i32 = arith.constant 0 : i32
    %c0_i32_0 = arith.constant 0 : i32
    %c0_i32_1 = arith.constant 0 : i32
    return %c0_i32, %c0_i32_0 : i32, i32
  }
}

</mosaic_0001>

<bundles_post_ra>
// kernel: student_bert_classifier_forward.1
= control target key start
LH: loop header
LB: loop body
LE: loop exit
PB: predicated region body
PF: predicated region fallthrough
CT: control target
= control target key end

     0   :  { %s4032_s0 = inlined_call_operand.vmem [shape: f32[16,32], index: 0, kind: input, shape index: {}]   ;;  %s4033_s1 = inlined_call_operand.vmem [shape: f32[2,8], index: 1, kind: input, shape index: {}]   ;;  %s4034_s2 = inlined_call_operand.vmem [shape: f32[1,32], index: 2, kind: input, shape index: {}]   ;;  %s4035_s3 = inlined_call_operand.vmem [shape: f32[1,32], index: 3, kind: input, shape index: {}]   ;;  %s4036_s4 = inlined_call_operand.vmem [shape: f32[2,32,96], index: 4, kind: input, shape index: {}]   ;;  %s4037_s5 = inlined_call_operand.vmem [shape: f32[2,32,32], index: 5, kind: input, shape index: {}]   ;;  %s4038_s6 = inlined_call_operand.vmem [shape: f32[2,32,128], index: 6, kind: input, shape index: {}]   ;;  %s4039_s7 = inlined_call_operand.vmem [shape: f32[2,128,32], index: 7, kind: input, shape index: {}]   ;;  %s4040_s8 = inlined_call_operand.vmem [shape: f32[2,8,128], index: 8, kind: input, shape index: {}]   ;;  %s4041_s9 = inlined_call_operand.vmem [shape: f32[32,32], index: 9, kind: input, shape index: {}]   ;;  %s4042_s10 = inlined_call_operand.vmem [shape: f32[1,32], index: 10, kind: input, shape index: {}]   ;;  %s4043_s11 = inlined_call_operand.vmem [shape: f32[32,3], index: 11, kind: input, shape index: {}]   ;;  %s4044_s12 = inlined_call_operand.vmem [shape: f32[1,3], index: 12, kind: input, shape index: {}]   ;;  %s4045_s13 = inlined_call_operand.hbm [shape: f32[16,32], index: 13, kind: output, shape index: {0}]   ;;  %s4046_s14 = inlined_call_operand.hbm [shape: f32[2,32], index: 14, kind: output, shape index: {1}]   ;;  %s4047_s15 = inlined_call_operand.hbm [shape: f32[2,3], index: 15, kind: output, shape index: {2}]  }
   0x1   :  { %4049 = sst [smem:[#allocation10_spill]] %s4045_s13 }
   0x2   :  { %4050 = sst [smem:[#allocation11_spill]] %s4046_s14 }
   0x3   :  { %4051 = sst [smem:[#allocation12_spill]] %s4047_s15 }
   0x4   :  { %21 = vsyncpa [#allocation3], 0 }
   0x5   :  { %22 = vsyncpa [#allocation5], 0  ;;  %s3678_s18 = smov 0  }
   0x6 LB: > { %4052 = sst [smem:[#allocation9_spill]] %s3575_s18  ;;  %s3684_s19 = sadd.s32 4294967295, %s3575_s18   ;;  %s3575_s18 = sphi %s3678_s18, %s28_s18  }
   0x7   : > { %p3054_p0 = scmp.ge.s32.totalorder %s3575_s18, 1  ;;  %p468_p1 = scmp.lt.s32.totalorder %s3575_s18, 3 }
   0x9   : > { %p469_p2 = pnand %p3054_p0, %p468_p1 }
   0xa   : > { %p530_p3 = scmp.lt.s32.totalorder (!%p469_p2), %s3684_s19, 1  ;;  %p3064_p4 = scmp.ne.s32.totalorder (!%p469_p2), %s3684_s19, 0 }
   0xb   : > { %472 = sbr.rel (%p469_p2) target bundleno = 5024 (0x13a0), region = 72 }
  0x10   : > { %s531_s20 = scalar_select %p530_p3, %s3684_s19, 1 }
  0x12   : > { %s3120_s21 = sshll.u32 %s531_s20, 5  ;;  %s3123_s22 = sshll.u32 %s531_s20, 7 }
  0x13   : > { %s3693_s25 = scalar_lea.vmem %s4036_s4, %s3120_s21  ;;  %s3698_s28 = scalar_lea.vmem %s4037_s5, %s3120_s21 }
  0x14   : > { %s3703_s16 = scalar_lea.vmem %s4038_s6, %s3120_s21  ;;  %s3708_s15 = scalar_lea.vmem %s4039_s7, %s3123_s22 }
  0x15   : > { %s3063_s13 = sshll.u32 %s531_s20, 3  ;;  %557 = sbr.rel (%p3064_p4) target bundleno = 340 (0x154), region = 76 }
  0x16   : > { %s3713_s24 = scalar_lea.vmem %s4040_s8, %s3063_s13 }
  0x1a   : > { %v558_v0 = vld [vmem:[%s4032_s0] sm:$0xff]  ;;  %vm562_vm0 = vcmask 261120   ;;  %v559_v1 = vld [vmem:[%s4032_s0 + $0x8] sm:$0xff] }
  0x1b   : > { %v563_v2 = vsel %vm562_vm0, %v558_v0, 0.0  ;;  %v566_v3 = vsel %vm562_vm0, %v559_v1, 0.0  ;;  %v3065_v21 = vld [vmem:[%s4034_s2] ss:$0 sm:$0xff] }
  0x1c   : > { %564 = vadd.xlane.f32.xlu0 %v563_v2  ;;  %v3066_v23 = vld [vmem:[%s4035_s3] ss:$0 sm:$0xff] }
  0x20   : > { %567 = vadd.xlane.f32.xlu0 %v566_v3 }
  0xa5   : > { %v565_v4 = vpop.xlane.xlu0 %564 }
  0xa6   : > { %v570_v5 = vmul.f32 0.03125, %v565_v4 }
  0xa8   : > { %v572_v6 = vsub.f32 %v558_v0, %v570_v5 }
  0xa9   : > { %v568_v7 = vpop.xlane.xlu0 %567 }
  0xaa   : > { %v571_v8 = vmul.f32 0.03125, %v568_v7  ;;  %v574_v9 = vmul.f32 %v572_v6, %v572_v6 }
  0xac   : > { %v573_v10 = vsub.f32 %v559_v1, %v571_v8  ;;  %v576_v11 = vsel %vm562_vm0, %v574_v9, 0.0 }
  0xad   : > { %577 = vadd.xlane.f32.xlu1 %v576_v11 }
  0xae   : > { %v575_v12 = vmul.f32 %v573_v10, %v573_v10 }
  0xb0   : > { %v579_v13 = vsel %vm562_vm0, %v575_v12, 0.0 }
  0xb1   : > { %580 = vadd.xlane.f32.xlu1 %v579_v13 }
 0x136   : > { %v578_v14 = vpop.xlane.xlu1 %577 }
 0x137   : > { %v582_v15 = vmul.f32 0.03125, %v578_v14 }
 0x139   : > { %v584_v16 = vadd.f32 1e-12, %v582_v15 }
 0x13a   : > { %v581_v17 = vpop.xlane.xlu1 %580 }
 0x13b   : > { %3434 = vrsqrt.f32 %v584_v16  ;;  %v583_v18 = vmul.f32 0.03125, %v581_v17 }
 0x13d   : > { %v585_v19 = vadd.f32 1e-12, %v583_v18 }
 0x13f   : > { %3436 = vrsqrt.f32 %v585_v19 }
 0x148   : > { %v3435_v20 = vpop.eup %3434 }
 0x149   : > { %v588_v22 = vmul.f32 %v3435_v20, %v572_v6 }
 0x14b   : > { %v596_v24 = vmul.f32 %v3065_v21, %v588_v22 }
 0x14c   : > { %v3437_v25 = vpop.eup %3436 }
 0x14d   : > { %v604_v26 = vadd.f32 %v3066_v23, %v596_v24  ;;  %v589_v27 = vmul.f32 %v3437_v25, %v573_v10 }
 0x14f   : > { %606 = vst.msk [vmem:[#allocation2] sm:$0xff] %vm562_vm0, %v604_v26  ;;  %v597_v28 = vmul.f32 %v3065_v21, %v589_v27 }
 0x151   : > { %v605_v29 = vadd.f32 %v3066_v23, %v597_v28 }
 0x153   : > { %607 = vst.msk [vmem:[#allocation2 + $0x8] sm:$0xff] %vm562_vm0, %v605_v29 }
 0x154 PF: > { %v614_v30 = vld [vmem:[%s3693_s25 + $0x18] sm:$0xff]  ;;  %v613_v31 = vld [vmem:[%s3693_s25 + $0x10] sm:$0xff]  ;;  %vm619_vm1 = vcmask 261120   ;;  %v612_v33 = vld [vmem:[%s3693_s25 + $0x8] sm:$0xff]  ;;  %v3577_v36 = vmov 0.0   ;;  %v615_v37 = vlaneseq  ;;  %vm3578_vm2 = vmmov 0  }
 0x155   : > { %3208 = vmatprep.subr.mxu0 %v614_v30  ;;  %v611_v34 = vld [vmem:[%s3693_s25] sm:$0xff]  ;;  %3244 = vmatprep.subr.mxu1 %v3577_v36  ;;  %s3579_s22 = smov 96   ;;  %vm730_vm3 = vcmask 64512   ;;  %v3580_v48 = vmov 1966171168   ;;  %s3581_s17 = smov 64  }
 0x156   : > { %v3736_v32 = vld [vmem:[#allocation2] sm:$0xff]  ;;  %3209 = vmatpush3.msra.mxu0 %v614_v30  ;;  %v3748_v38 = vshrl.u32 %v615_v37, 7  ;;  %3246 = vmatprep.mubr.msk.f32.mxu1 %vm3578_vm2, %v3577_v36  ;;  %v706_v49 = vunpack.c.l.s4 %v3580_v48  ;;  %s3582_s23 = smov 88   ;;  %s3583_s26 = smov 120  }
 0x157   : > { %3216 = vmatprep.mubr.msk.f32.mxu0 %vm619_vm1, %v3736_v32  ;;  %3210 = vmatprep.subr.mxu0 %v613_v31  ;;  %v3756_v40 = vld [vmem:[%s3713_s24] sm:$0xff]  ;;  %s3584_s27 = smov 56   ;;  %s3585_s21 = smov 112  }
 0x158   : > { %3211 = vmatpush3.msra.mxu0 %v613_v31  ;;  %v617_v39 = vsub.s32 0, %v3748_v38  ;;  %v701_v50 = vld [vmem:[%s4033_s1] sm:$0x3]  ;;  %v707_v52 = vunpack.c.0.s8 %v706_v49  ;;  %s3586_s29 = smov 80   ;;  %s3587_s13 = smov 48  }
 0x159   : > { %3212 = vmatprep.subr.mxu0 %v612_v33  ;;  %v702_v51 = vsub.f32 1.0, %v701_v50  ;;  %s3588_s14 = smov 72   ;;  %s3589_s18 = smov 104  }
 0x15a   : > { %3213 = vmatpush3.msra.mxu0 %v612_v33  ;;  %v3742_v35 = vld [vmem:[#allocation2 + $0x8] sm:$0xff]  ;;  %v618_v42 = vrot.slane %v3756_v40, %v617_v39  ;;  %v710_v54 = vsub.s32 %v707_v52, %v3748_v38  ;;  %s3590_s20 = smov 40   ;;  %p3107_p5 = scmp.ne.s32.totalorder %s3684_s19, 1 }
 0x15b   : > { %3214 = vmatprep.subr.mxu0 %v611_v34  ;;  %v703_v53 = vmul.f32 -10000.0, %v702_v51 }
 0x15c   : > { %3215 = vmatpush3.msra.mxu0 %v611_v34 }
 0x15d   : > { %3217 = vmatmul.mubr.msk.f32.vlgmr.msra.gmra.mxu0 %vm619_vm1, %v3742_v35  ;;  %3219 = vmatprep.subr.mxu0 %v3577_v36  ;;  %v711_v55 = vrot.slane %v703_v53, %v710_v54 }
 0x15e   : > { %3221 = vmatprep.mubr.msk.f32.mxu0 %vm3578_vm2, %v3577_v36 }
 0x15f   : > { %v719_v56 = vrot.slane %v711_v55, %v710_v54  ;;  %v712_v57 = vcombine.high %v711_v55, %v711_v55 }
 0x161   : > { %v3781_v58 = vrot.slane %v719_v56, %v617_v39  ;;  %v726_v59 = vrot.slane %v712_v57, %v710_v54 }
 0x163   : > { %v3784_v0 = vrot.slane %v726_v59, %v617_v39 }
 0x21d   : > { %v3218_v41 = vpop.f32.mrf.mxu0 }
 0x21e   : > { %v3762_v45 = vadd.f32 %v3218_v41, %v618_v42 }
 0x21f   : > { %v692_v43 = vpop.f32.mrf.mxu0 }
 0x220   : > { %v3759_v44 = vadd.f32 %v692_v43, %v618_v42 }
 0x222   : > { %728 = vrot.lane.b32.xlu0 %v3759_v44, %s3579_s22 }
 0x226   : > { %806 = vrot.lane.b32.xlu0 %v3762_v45, %s3579_s22 }
 0x294   : > { %v729_v46 = vpop.permute.xlu0 %728 }
 0x295   : > { %3220 = vmatpush3.xpose.msk.msra.mxu0 %vm730_vm3, %v729_v46 }
 0x296   : > { %3224 = vmatprep.subr.mxu0 %v3577_v36 }
 0x298   : > { %3222 = vmatmul.mubr.msk.f32.vlgmr.msra.gmra.mxu0 %vm730_vm3, %v3759_v44  ;;  %v807_v47 = vpop.permute.xlu0 %806 }
 0x299   : > { %3225 = vmatpush3.xpose.msk.msra.mxu0 %vm730_vm3, %v807_v47  ;;  %3226 = vmatprep.mubr.msk.f32.mxu0 %vm3578_vm2, %v3577_v36 }
 0x29a   : > { %3229 = vmatprep.subr.mxu0 %v3577_v36 }
 0x29c   : > { %3227 = vmatmul.mubr.msk.f32.vlgmr.msra.gmra.mxu0 %vm730_vm3, %v3762_v45 }
 0x29d   : > { %3231 = vmatprep.mubr.msk.f32.mxu0 %vm3578_vm2, %v3577_v36 }
 0x358   : > { %v801_v60 = vpop.f32.mrf.mxu0 }
 0x359   : > { %v882_v61 = vmul.f32 0.35355338, %v801_v60 }
 0x35a   : > { %v3223_v62 = vpop.f32.mrf.mxu0 }
 0x35b   : > { %v894_v63 = vadd.f32 %v3781_v58, %v882_v61  ;;  %v1070_v62 = vld [vmem:[%s3698_s28] sm:$0xff] }
 0x35c   : > { %v878_v1 = vpop.f32.mrf.mxu0 }
 0x35d   : > { %v883_v2 = vmul.f32 0.35355338, %v878_v1  ;;  %v896_v3 = vsel %vm730_vm3, %v894_v63, -inf }
 0x35e   : > { %897 = vmax.xlane.f32.xlu1 %v896_v3  ;;  %v3228_v4 = vpop.f32.mrf.mxu0 }
 0x35f   : > { %v895_v5 = vadd.f32 %v3784_v0, %v883_v2 }
 0x361   : > { %v899_v6 = vsel %vm730_vm3, %v895_v5, -inf }
 0x362   : > { %900 = vmax.xlane.f32.xlu1 %v899_v6 }
 0x373   : > { %918 = vrot.lane.b32.xlu1 %v3759_v44, %s3581_s17 }
 0x377   : > { %994 = vrot.lane.b32.xlu1 %v3762_v45, %s3581_s17 }
 0x37b   : > { %1073 = vrot.lane.b32.xlu1 %v3759_v44, %s3582_s23 }
 0x37f   : > { %1151 = vrot.lane.b32.xlu1 %v3762_v45, %s3582_s23 }
 0x3e7   : > { %v898_v7 = vpop.xlane.xlu1 %897 }
 0x3e8   : > { %v902_v8 = vsub.f32 %v894_v63, %v898_v7 }
 0x3ea   : > { %v904_v9 = vmul.f32 1.442695, %v902_v8 }
 0x3eb   : > { %v901_v10 = vpop.xlane.xlu1 %900 }
 0x3ec   : > { %3438 = vpow2.f32 %v904_v9  ;;  %v903_v11 = vsub.f32 %v895_v5, %v901_v10  ;;  %v1405_v10 = vld [vmem:[%s3698_s28 + $0x8] sm:$0xff] }
 0x3ee   : > { %v906_v12 = vmul.f32 1.442695, %v903_v11 }
 0x3ef   : > { %v919_v13 = vpop.permute.xlu1 %918 }
 0x3f0   : > { %3440 = vpow2.f32 %v906_v12  ;;  %3230 = vmatpush3.msra.mxu0 %v919_v13 }
 0x3f1   : > { %3234 = vmatprep.subr.mxu0 %v3577_v36 }
 0x3f3   : > { %v995_v14 = vpop.permute.xlu1 %994 }
 0x3f7   : > { %v1074_v15 = vpop.permute.xlu1 %1073 }
 0x3f9   : > { %v3439_v16 = vpop.eup %3438 }
 0x3fa   : > { %v908_v17 = vsel %vm730_vm3, %v3439_v16, 0.0 }
 0x3fb   : > { %909 = vadd.xlane.f32.xlu0 %v908_v17  ;;  %v1152_v18 = vpop.permute.xlu1 %1151 }
 0x3fc   : > { %3245 = vmatpush3.xpose.msk.msra.mxu1 %vm730_vm3, %v1152_v18 }
 0x3fd   : > { %v3441_v19 = vpop.eup %3440  ;;  %3254 = vmatprep.subr.mxu1 %v3577_v36 }
 0x3fe   : > { %v911_v20 = vsel %vm730_vm3, %v3441_v19, 0.0 }
 0x3ff   : > { %912 = vadd.xlane.f32.xlu1 %v911_v20 }
 0x410   : > { %1149 = vrot.lane.b32.xlu1 %v3762_v45, %s3583_s26 }
 0x411   : > { %1071 = vrot.lane.b32.xlu0 %v3759_v44, %s3583_s26 }
 0x484   : > { %v910_v21 = vpop.xlane.xlu0 %909 }
 0x485   : > { %3442 = vrcp.f32 %v910_v21 }
 0x488   : > { %v913_v22 = vpop.xlane.xlu1 %912  ;;  %v1072_v28 = vpop.permute.xlu0 %1071 }
 0x489   : > { %3444 = vrcp.f32 %v913_v22 }
 0x48c   : > { %v1150_v23 = vpop.permute.xlu1 %1149 }
 0x48d   : > { %3247 = vmatmul.mubr.msk.f32.vlgmr.msra.gmra.mxu1 %vm730_vm3, %v1150_v23 }
 0x48e   : > { %3256 = vmatprep.mubr.msk.f32.mxu1 %vm3578_vm2, %v3577_v36 }
 0x492   : > { %v3443_v24 = vpop.eup %3442 }
 0x493   : > { %v915_v25 = vmul.f32 %v3443_v24, %v3439_v16 }
 0x495   : > { %3232 = vmatmul.mubr.msk.f32.vlgmr.msra.gmra.mxu0 %vm730_vm3, %v915_v25 }
 0x496   : > { %v3445_v26 = vpop.eup %3444  ;;  %3235 = vmatpush3.msra.mxu0 %v995_v14  ;;  %3236 = vmatprep.mubr.msk.f32.mxu0 %vm3578_vm2, %v3577_v36 }
 0x497   : > { %3239 = vmatprep.subr.mxu0 %v3577_v36  ;;  %v917_v27 = vmul.f32 %v3445_v26, %v3441_v19 }
 0x499   : > { %3237 = vmatmul.mubr.msk.f32.vlgmr.msra.gmra.mxu0 %vm730_vm3, %v917_v27 }
 0x49a   : > { %3240 = vmatpush3.xpose.msk.msra.mxu0 %vm730_vm3, %v1074_v15  ;;  %3241 = vmatprep.mubr.msk.f32.mxu0 %vm3578_vm2, %v3577_v36 }
 0x49b   : > { %3249 = vmatprep.subr.mxu0 %v3577_v36 }
 0x49d   : > { %3242 = vmatmul.mubr.msk.f32.vlgmr.msra.gmra.mxu0 %vm730_vm3, %v1072_v28 }
 0x49e   : > { %3251 = vmatprep.mubr.msk.f32.mxu0 %vm3578_vm2, %v3577_v36 }
 0x54d   : > { %v1223_v29 = vpop.f32.mrf.mxu1 }
 0x54e   : > { %v1228_v30 = vmul.f32 0.35355338, %v1223_v29 }
 0x54f   : > { %v3248_v31 = vpop.f32.mrf.mxu1 }
 0x550   : > { %v1230_v33 = vadd.f32 %v1228_v30, %v3784_v0 }
 0x552   : > { %v1234_v34 = vsel %vm730_vm3, %v1230_v33, -inf }
 0x553   : > { %1235 = vmax.xlane.f32.xlu0 %v1234_v34 }
 0x555   : > { %v990_v37 = vpop.f32.mrf.mxu0 }
 0x557   : > { %v3233_v39 = vpop.f32.mrf.mxu0 }
 0x559   : > { %v1066_v41 = vpop.f32.mrf.mxu0 }
 0x55b   : > { %v3238_v42 = vpop.f32.mrf.mxu0 }
 0x55d   : > { %v1145_v43 = vpop.f32.mrf.mxu0 }
 0x55e   : > { %v1227_v46 = vmul.f32 0.35355338, %v1145_v43 }
 0x55f   : > { %v3243_v47 = vpop.f32.mrf.mxu0 }
 0x560   : > { %v1229_v48 = vadd.f32 %v1227_v46, %v3781_v58 }
 0x562   : > { %v1231_v49 = vsel %vm730_vm3, %v1229_v48, -inf }
 0x563   : > { %1232 = vmax.xlane.f32.xlu1 %v1231_v49 }
 0x569   : > { %1329 = vrot.lane.b32.xlu0 %v3762_v45, %s3584_s27 }
 0x56d   : > { %1568 = vrot.lane.b32.xlu0 %v3759_v44, %s3585_s21 }
 0x5dc   : > { %v1236_v50 = vpop.xlane.xlu0 %1235 }
 0x5dd   : > { %v1238_v51 = vsub.f32 %v1230_v33, %v1236_v50 }
 0x5df   : > { %v1241_v52 = vmul.f32 1.442695, %v1238_v51 }
 0x5e0   : > { %v1330_v53 = vpop.permute.xlu0 %1329 }
 0x5e1   : > { %3446 = vpow2.f32 %v1241_v52  ;;  %3255 = vmatpush3.msra.mxu1 %v1330_v53 }
 0x5e2   : > { %3264 = vmatprep.subr.mxu1 %v1070_v62 }
 0x5e4   : > { %v1569_v21 = vpop.permute.xlu0 %1568 }
 0x5ec   : > { %v1233_v54 = vpop.xlane.xlu1 %1232 }
 0x5ed   : > { %v1237_v55 = vsub.f32 %v1229_v48, %v1233_v54 }
 0x5ee   : > { %v3447_v56 = vpop.eup %3446 }
 0x5ef   : > { %v1239_v57 = vmul.f32 1.442695, %v1237_v55  ;;  %v1246_v59 = vsel %vm730_vm3, %v3447_v56, 0.0 }
 0x5f0   : > { %1247 = vadd.xlane.f32.xlu1 %v1246_v59 }
 0x5f1   : > { %3448 = vpow2.f32 %v1239_v57  ;;  %v1902_v57 = vld [vmem:[%s3698_s28 + $0x10] sm:$0xff] }
 0x5fe   : > { %v3449_v60 = vpop.eup %3448 }
 0x5ff   : > { %v1243_v61 = vsel %vm730_vm3, %v3449_v60, 0.0 }
 0x600   : > { %1244 = vadd.xlane.f32.xlu1 %v1243_v61 }
 0x611   : > { %1253 = vrot.lane.b32.xlu1 %v3759_v44, %s3584_s27 }
 0x615   : > { %1570 = vrot.lane.b32.xlu1 %v3759_v44, %s3586_s29 }
 0x619   : > { %1648 = vrot.lane.b32.xlu1 %v3762_v45, %s3586_s29 }
 0x61d   : > { %1646 = vrot.lane.b32.xlu1 %v3762_v45, %s3585_s21 }
 0x679   : > { %v1248_v63 = vpop.xlane.xlu1 %1247 }
 0x67a   : > { %3450 = vrcp.f32 %v1248_v63 }
 0x687   : > { %v3451_v1 = vpop.eup %3450 }
 0x688   : > { %v1252_v2 = vmul.f32 %v3451_v1, %v3447_v56 }
 0x689   : > { %v1245_v3 = vpop.xlane.xlu1 %1244 }
 0x68a   : > { %3452 = vrcp.f32 %v1245_v3  ;;  %3257 = vmatmul.mubr.msk.f32.vlgmr.msra.gmra.mxu1 %vm730_vm3, %v1252_v2 }
 0x68b   : > { %3266 = vmatprep.mubr.msk.f32.mxu1 %vm730_vm3, %v990_v37  ;;  %3265 = vmatpush3.msra.mxu1 %v1070_v62 }
 0x68c   : > { %3274 = vmatprep.subr.mxu1 %v3577_v36 }
 0x68d   : > { %v1254_v4 = vpop.permute.xlu1 %1253 }
 0x68e   : > { %3250 = vmatpush3.msra.mxu0 %v1254_v4  ;;  %3267 = vmatmul.mubr.msk.f32.vlgmr.msra.gmra.mxu1 %vm730_vm3, %v1066_v41 }
 0x68f   : > { %3276 = vmatprep.mubr.msk.f32.mxu1 %vm3578_vm2, %v3577_v36  ;;  %3259 = vmatprep.subr.mxu0 %v1405_v10 }
 0x691   : > { %v1571_v5 = vpop.permute.xlu1 %1570 }
 0x695   : > { %v1649_v6 = vpop.permute.xlu1 %1648 }
 0x696   : > { %3275 = vmatpush3.xpose.msk.msra.mxu1 %vm730_vm3, %v1649_v6 }
 0x697   : > { %v3453_v7 = vpop.eup %3452  ;;  %3284 = vmatprep.subr.mxu1 %v3577_v36 }
 0x698   : > { %v1250_v8 = vmul.f32 %v3453_v7, %v3449_v60 }
 0x699   : > { %v1647_v9 = vpop.permute.xlu1 %1646 }
 0x69a   : > { %3252 = vmatmul.mubr.msk.f32.vlgmr.msra.gmra.mxu0 %vm730_vm3, %v1250_v8  ;;  %3277 = vmatmul.mubr.msk.f32.vlgmr.msra.gmra.mxu1 %vm730_vm3, %v1647_v9 }
 0x69b   : > { %3286 = vmatprep.mubr.msk.f32.mxu1 %vm3578_vm2, %v3577_v36  ;;  %3260 = vmatpush3.msra.mxu0 %v1405_v10 }
 0x69c   : > { %3269 = vmatprep.subr.mxu0 %v3577_v36 }
 0x74a   : > { %v1401_v11 = vpop.f32.mrf.mxu1 }
 0x74c   : > { %v3258_v12 = vpop.f32.mrf.mxu1 }
 0x74e   : > { %v3842_v13 = vpop.f32.mrf.mxu1 }
 0x750   : > { %v3844_v14 = vpop.f32.mrf.mxu1 }
 0x75a   : > { %v1325_v15 = vpop.f32.mrf.mxu0  ;;  %v1720_v16 = vpop.f32.mrf.mxu1 }
 0x75b   : > { %v1725_v17 = vmul.f32 0.35355338, %v1720_v16  ;;  %3261 = vmatprep.mubr.msk.f32.mxu0 %vm730_vm3, %v1325_v15 }
 0x75c   : > { %v3253_v18 = vpop.f32.mrf.mxu0  ;;  %3262 = vmatmul.mubr.msk.f32.vlgmr.msra.gmra.mxu0 %vm730_vm3, %v1401_v11  ;;  %v3278_v19 = vpop.f32.mrf.mxu1 }
 0x75d   : > { %3270 = vmatpush3.xpose.msk.msra.mxu0 %vm730_vm3, %v1571_v5  ;;  %3271 = vmatprep.mubr.msk.f32.mxu0 %vm3578_vm2, %v3577_v36  ;;  %v1727_v20 = vadd.f32 %v1725_v17, %v3784_v0 }
 0x75e   : > { %3279 = vmatprep.subr.mxu0 %v3577_v36 }
 0x75f   : > { %v1731_v22 = vsel %vm730_vm3, %v1727_v20, -inf }
 0x760   : > { %1732 = vmax.xlane.f32.xlu1 %v1731_v22  ;;  %3272 = vmatmul.mubr.msk.f32.vlgmr.msra.gmra.mxu0 %vm730_vm3, %v1569_v21 }
 0x761   : > { %3281 = vmatprep.mubr.msk.f32.mxu0 %vm3578_vm2, %v3577_v36 }
 0x771   : > { %1750 = vrot.lane.b32.xlu1 %v3759_v44, %s3587_s13 }
 0x775   : > { %1988 = vrot.lane.b32.xlu1 %v3759_v44, %s3588_s14 }
 0x779   : > { %2066 = vrot.lane.b32.xlu1 %v3762_v45, %s3588_s14 }
 0x77d   : > { %2064 = vrot.lane.b32.xlu1 %v3762_v45, %s3589_s18 }
 0x7e9   : > { %v1733_v23 = vpop.xlane.xlu1 %1732 }
 0x7ea   : > { %v1735_v25 = vsub.f32 %v1727_v20, %v1733_v23 }
 0x7ec   : > { %v1738_v26 = vmul.f32 1.442695, %v1735_v25 }
 0x7ed   : > { %v1751_v24 = vpop.permute.xlu1 %1750 }
 0x7ee   : > { %3280 = vmatpush3.msra.mxu0 %v1751_v24  ;;  %3454 = vpow2.f32 %v1738_v26 }
 0x7ef   : > { %3289 = vmatprep.subr.mxu0 %v1902_v57 }
 0x7f1   : > { %v1989_v53 = vpop.permute.xlu1 %1988 }
 0x7f5   : > { %v2067_v3 = vpop.permute.xlu1 %2066 }
 0x7f9   : > { %v2065_v6 = vpop.permute.xlu1 %2064 }
 0x7fb   : > { %v3455_v37 = vpop.eup %3454 }
 0x7fc   : > { %v1743_v39 = vsel %vm730_vm3, %v3455_v37, 0.0 }
 0x81c   : > { %v3862_v27 = vpop.f32.mrf.mxu0 }
 0x81d   : > { %v1565_v11 = vadd.f32 %v3842_v13, %v3862_v27 }
 0x81e   : > { %v3864_v28 = vpop.f32.mrf.mxu0 }
 0x81f   : > { %v1560_v15 = vadd.f32 %v3844_v14, %v3864_v28 }
 0x820   : > { %v1642_v29 = vpop.f32.mrf.mxu0 }
 0x821   : > { %v1724_v30 = vmul.f32 0.35355338, %v1642_v29 }
 0x822   : > { %v3273_v31 = vpop.f32.mrf.mxu0 }
 0x823   : > { %v1726_v33 = vadd.f32 %v1724_v30, %v3781_v58 }
 0x825   : > { %v1728_v34 = vsel %vm730_vm3, %v1726_v33, -inf }
 0x826   : > { %1729 = vmax.xlane.f32.xlu0 %v1728_v34 }
 0x82a   : > { %1744 = vadd.xlane.f32.xlu0 %v1743_v39 }
 0x8af   : > { %v1730_v41 = vpop.xlane.xlu0 %1729 }
 0x8b0   : > { %v1734_v42 = vsub.f32 %v1726_v33, %v1730_v41 }
 0x8b2   : > { %v1736_v43 = vmul.f32 1.442695, %v1734_v42 }
 0x8b3   : > { %v1745_v48 = vpop.xlane.xlu0 %1744 }
 0x8b4   : > { %3456 = vpow2.f32 %v1736_v43 }
 0x8b5   : > { %3458 = vrcp.f32 %v1745_v48 }
 0x8c1   : > { %v3457_v46 = vpop.eup %3456 }
 0x8c2   : > { %v1740_v47 = vsel %vm730_vm3, %v3457_v46, 0.0  ;;  %v3459_v50 = vpop.eup %3458 }
 0x8c3   : > { %1741 = vadd.xlane.f32.xlu0 %v1740_v47  ;;  %v1749_v52 = vmul.f32 %v3459_v50, %v3455_v37 }
 0x8d9   : > { %1826 = vrot.lane.b32.xlu0 %v3762_v45, %s3587_s13 }
 0x8dd   : > { %1986 = vrot.lane.b32.xlu0 %v3759_v44, %s3589_s18 }
 0x94c   : > { %v1742_v49 = vpop.xlane.xlu0 %1741 }
 0x94d   : > { %3460 = vrcp.f32 %v1742_v49 }
 0x950   : > { %v1827_v51 = vpop.permute.xlu0 %1826 }
 0x951   : > { %3285 = vmatpush3.msra.mxu1 %v1827_v51 }
 0x952   : > { %3287 = vmatmul.mubr.msk.f32.vlgmr.msra.gmra.mxu1 %vm730_vm3, %v1749_v52  ;;  %3294 = vmatprep.subr.mxu1 %v3577_v36 }
 0x953   : > { %3295 = vmatpush3.xpose.msk.msra.mxu1 %vm730_vm3, %v1989_v53  ;;  %3296 = vmatprep.mubr.msk.f32.mxu1 %vm3578_vm2, %v3577_v36 }
 0x954   : > { %v1987_v54 = vpop.permute.xlu0 %1986  ;;  %3304 = vmatprep.subr.mxu1 %v3577_v36 }
 0x956   : > { %3297 = vmatmul.mubr.msk.f32.vlgmr.msra.gmra.mxu1 %vm730_vm3, %v1987_v54 }
 0x957   : > { %3306 = vmatprep.mubr.msk.f32.mxu1 %vm3578_vm2, %v3577_v36 }
 0x95a   : > { %v3461_v55 = vpop.eup %3460 }
 0x95b   : > { %v1747_v56 = vmul.f32 %v3461_v55, %v3457_v46 }
 0x95d   : > { %3282 = vmatmul.mubr.msk.f32.vlgmr.msra.gmra.mxu0 %vm730_vm3, %v1747_v56 }
 0x95e   : > { %3290 = vmatpush3.msra.mxu0 %v1902_v57 }
 0x95f   : > { %3299 = vmatprep.subr.mxu0 %v3577_v36 }
 0xa12   : > { %v1898_v59 = vpop.f32.mrf.mxu1 }
 0xa14   : > { %v3288_v60 = vpop.f32.mrf.mxu1 }
 0xa16   : > { %v2060_v61 = vpop.f32.mrf.mxu1 }
 0xa17   : > { %v2142_v62 = vmul.f32 0.35355338, %v2060_v61 }
 0xa18   : > { %v3298_v63 = vpop.f32.mrf.mxu1 }
 0xa19   : > { %v2144_v1 = vadd.f32 %v2142_v62, %v3781_v58 }
 0xa1b   : > { %v2146_v2 = vsel %vm730_vm3, %v2144_v1, -inf }
 0xa1c   : > { %2147 = vmax.xlane.f32.xlu0 %v2146_v2  ;;  %v2453_v2 = vld [vmem:[%s3703_s16 + $0x10] sm:$0xff] }
 0xa1d   : > { %v1822_v4 = vpop.f32.mrf.mxu0 }
 0xa1e   : > { %3291 = vmatprep.mubr.msk.f32.mxu0 %vm730_vm3, %v1822_v4  ;;  %v2451_v4 = vld [vmem:[%s3703_s16] sm:$0xff] }
 0xa1f   : > { %v3283_v5 = vpop.f32.mrf.mxu0  ;;  %3292 = vmatmul.mubr.msk.f32.vlgmr.msra.gmra.mxu0 %vm730_vm3, %v1898_v59 }
 0xa20   : > { %3300 = vmatpush3.xpose.msk.msra.mxu0 %vm730_vm3, %v2067_v3  ;;  %3301 = vmatprep.mubr.msk.f32.mxu0 %vm3578_vm2, %v3577_v36  ;;  %v2452_v3 = vld [vmem:[%s3703_s16 + $0x8] sm:$0xff] }
 0xa21   : > { %3309 = vmatprep.subr.mxu0 %v3577_v36 }
 0xa23   : > { %3302 = vmatmul.mubr.msk.f32.vlgmr.msra.gmra.mxu0 %vm730_vm3, %v2065_v6 }
 0xa24   : > { %3311 = vmatprep.mubr.msk.f32.mxu0 %vm3578_vm2, %v3577_v36 }
 0xaa5   : > { %v2148_v58 = vpop.xlane.xlu0 %2147 }
 0xaa6   : > { %v2152_v7 = vsub.f32 %v2144_v1, %v2148_v58  ;;  %v2454_v1 = vld [vmem:[%s3703_s16 + $0x18] sm:$0xff] }
 0xaa8   : > { %v2154_v8 = vmul.f32 1.442695, %v2152_v7 }
 0xaaa   : > { %3462 = vpow2.f32 %v2154_v8 }
 0xab7   : > { %v3463_v9 = vpop.eup %3462 }
 0xab8   : > { %v2158_v10 = vsel %vm730_vm3, %v3463_v9, 0.0 }
 0xab9   : > { %2159 = vadd.xlane.f32.xlu0 %v2158_v10  ;;  %v2441_v10 = vsub.s32 2, %v3748_v38 }
 0xadf   : > { %v3293_v12 = vpop.f32.mrf.mxu0 }
 0xae0   : > { %v1985_v16 = vadd.f32 %v3293_v12, %v1565_v11  ;;  %v2442_v12 = vrot.slane %v3756_v40, %v2441_v10 }
 0xae1   : > { %v1975_v17 = vpop.f32.mrf.mxu0 }
 0xae2   : > { %v1984_v18 = vadd.f32 %v1975_v17, %v1560_v15  ;;  %v2447_v15 = vsub.s32 3, %v3748_v38 }
 0xae3   : > { %v2138_v19 = vpop.f32.mrf.mxu0 }
 0xae4   : > { %v2143_v36 = vmul.f32 0.35355338, %v2138_v19 }
 0xae5   : > { %v3303_v20 = vpop.f32.mrf.mxu0 }
 0xae6   : > { %v2145_v21 = vadd.f32 %v2143_v36, %v3784_v0  ;;  %v2448_v36 = vrot.slane %v3756_v40, %v2447_v15 }
 0xae8   : > { %v2149_v22 = vsel %vm730_vm3, %v2145_v21, -inf }
 0xae9   : > { %2150 = vmax.xlane.f32.xlu1 %v2149_v22 }
 0xafa   : > { %2168 = vrot.lane.b32.xlu1 %v3759_v44, %s3590_s20  ;;  %v2320_v44 = vld [vmem:[%s3698_s28 + $0x18] sm:$0xff] }
 0xb42   : > { %v2160_v13 = vpop.xlane.xlu0 %2159 }
 0xb43   : > { %3464 = vrcp.f32 %v2160_v13  ;;  %v2609_v13 = vld [vmem:[%s3708_s15 + $0x78] sm:$0xff] }
 0xb50   : > { %v3465_v24 = vpop.eup %3464 }
 0xb51   : > { %v2165_v27 = vmul.f32 %v3465_v24, %v3463_v9  ;;  %v2607_v24 = vld [vmem:[%s3708_s15 + $0x68] sm:$0xff] }
 0xb72   : > { %v2151_v23 = vpop.xlane.xlu1 %2150 }
 0xb73   : > { %v2153_v14 = vsub.f32 %v2145_v21, %v2151_v23  ;;  %v2608_v23 = vld [vmem:[%s3708_s15 + $0x70] sm:$0xff] }
 0xb75   : > { %v2156_v25 = vmul.f32 1.442695, %v2153_v14  ;;  %v2606_v14 = vld [vmem:[%s3708_s15 + $0x60] sm:$0xff] }
 0xb76   : > { %v2169_v26 = vpop.permute.xlu1 %2168 }
 0xb77   : > { %3466 = vpow2.f32 %v2156_v25  ;;  %3305 = vmatpush3.msra.mxu1 %v2169_v26  ;;  %v2605_v25 = vld [vmem:[%s3708_s15 + $0x58] sm:$0xff]  ;;  %v2604_v26 = vld [vmem:[%s3708_s15 + $0x50] sm:$0xff] }
 0xb78   : > { %3307 = vmatmul.mubr.msk.f32.vlgmr.msra.gmra.mxu1 %vm730_vm3, %v2165_v27  ;;  %3314 = vmatprep.subr.mxu1 %v2320_v44  ;;  %v2603_v27 = vld [vmem:[%s3708_s15 + $0x48] sm:$0xff] }
 0xb79   : > { %3315 = vmatpush3.msra.mxu1 %v2320_v44  ;;  %v2600_v44 = vld [vmem:[%s3708_s15 + $0x30] sm:$0xff] }
 0xb7a   : > { %3330 = vmatprep.subr.mxu1 %v2609_v13 }
 0xb84   : > { %v3467_v0 = vpop.eup %3466 }
 0xb85   : > { %v2161_v28 = vsel %vm730_vm3, %v3467_v0, 0.0 }
 0xb86   : > { %2162 = vadd.xlane.f32.xlu0 %v2161_v28  ;;  %v2601_v28 = vld [vmem:[%s3708_s15 + $0x38] sm:$0xff] }
 0xb9c   : > { %2244 = vrot.lane.b32.xlu0 %v3762_v45, %s3590_s20  ;;  %v2406_v45 = vsub.s32 1, %v3748_v38 }
 0xb9e   : > { %v2407_v42 = vrot.slane %v3756_v40, %v2406_v45 }
 0xc0f   : > { %v2163_v29 = vpop.xlane.xlu0 %2162 }
 0xc10   : > { %3468 = vrcp.f32 %v2163_v29  ;;  %v2599_v29 = vld [vmem:[%s3708_s15 + $0x28] sm:$0xff] }
 0xc13   : > { %v2245_v30 = vpop.permute.xlu0 %2244 }
 0xc14   : > { %3310 = vmatpush3.msra.mxu0 %v2245_v30  ;;  %v2598_v30 = vld [vmem:[%s3708_s15 + $0x20] sm:$0xff] }
 0xc15   : > { %3319 = vmatprep.subr.mxu0 %v2454_v1 }
 0xc1d   : > { %v3469_v31 = vpop.eup %3468 }
 0xc1e   : > { %v2167_v33 = vmul.f32 %v3469_v31, %v3467_v0  ;;  %v2602_v0 = vld [vmem:[%s3708_s15 + $0x40] sm:$0xff]  ;;  %v2597_v31 = vld [vmem:[%s3708_s15 + $0x18] sm:$0xff] }
 0xc20   : > { %3312 = vmatmul.mubr.msk.f32.vlgmr.msra.gmra.mxu0 %vm730_vm3, %v2167_v33  ;;  %v2596_v33 = vld [vmem:[%s3708_s15 + $0x10] sm:$0xff] }
 0xc21   : > { %3320 = vmatpush3.msra.mxu0 %v2454_v1 }
 0xc22   : > { %3321 = vmatprep.subr.mxu0 %v2453_v2 }
 0xc23   : > { %3322 = vmatpush3.msra.mxu0 %v2453_v2 }
 0xc24   : > { %3323 = vmatprep.subr.mxu0 %v2452_v3 }
 0xc25   : > { %3324 = vmatpush3.msra.mxu0 %v2452_v3 }
 0xc26   : > { %3325 = vmatprep.subr.mxu0 %v2451_v4 }
 0xc27   : > { %3326 = vmatpush3.msra.mxu0 %v2451_v4 }
 0xc38   : > { %v2240_v34 = vpop.f32.mrf.mxu1 }
 0xc39   : > { %3316 = vmatprep.mubr.msk.f32.mxu1 %vm730_vm3, %v2240_v34  ;;  %v2595_v34 = vld [vmem:[%s3708_s15 + $0x8] sm:$0xff] }
 0xc3a   : > { %v3308_v37 = vpop.f32.mrf.mxu1 }
 0xc3b   : > { %v2594_v37 = vld [vmem:[%s3708_s15] sm:$0xff] }
 0xce0   : > { %v2316_v39 = vpop.f32.mrf.mxu0 }
 0xce1   : > { %3317 = vmatmul.mubr.msk.f32.vlgmr.msra.gmra.mxu1 %vm730_vm3, %v2316_v39  ;;  %v2457_v39 = vsub.s32 4, %v3748_v38 }
 0xce2   : > { %v3313_v41 = vpop.f32.mrf.mxu0  ;;  %3331 = vmatpush3.msra.mxu1 %v2609_v13 }
 0xce3   : > { %3332 = vmatprep.subr.mxu1 %v2608_v23  ;;  %v2458_v41 = vrot.slane %v3756_v40, %v2457_v39 }
 0xce4   : > { %3333 = vmatpush3.msra.mxu1 %v2608_v23 }
 0xce5   : > { %3334 = vmatprep.subr.mxu1 %v2607_v24 }
 0xce6   : > { %3335 = vmatpush3.msra.mxu1 %v2607_v24 }
 0xce7   : > { %3336 = vmatprep.subr.mxu1 %v2606_v14 }
 0xce8   : > { %3337 = vmatpush3.msra.mxu1 %v2606_v14 }
 0xce9   : > { %3338 = vmatprep.subr.mxu1 %v2605_v25 }
 0xcea   : > { %3339 = vmatpush3.msra.mxu1 %v2605_v25 }
 0xceb   : > { %3340 = vmatprep.subr.mxu1 %v2604_v26 }
 0xcec   : > { %3341 = vmatpush3.msra.mxu1 %v2604_v26 }
 0xced   : > { %3342 = vmatprep.subr.mxu1 %v2603_v27 }
 0xcee   : > { %3343 = vmatpush3.msra.mxu1 %v2603_v27 }
 0xcef   : > { %3344 = vmatprep.subr.mxu1 %v2602_v0 }
 0xcf0   : > { %3345 = vmatpush3.msra.mxu1 %v2602_v0 }
 0xcf1   : > { %3346 = vmatprep.subr.mxu1 %v2601_v28 }
 0xcf2   : > { %3347 = vmatpush3.msra.mxu1 %v2601_v28 }
 0xcf3   : > { %3348 = vmatprep.subr.mxu1 %v2600_v44 }
 0xcf4   : > { %3349 = vmatpush3.msra.mxu1 %v2600_v44 }
 0xcf5   : > { %3350 = vmatprep.subr.mxu1 %v2599_v29 }
 0xcf6   : > { %3351 = vmatpush3.msra.mxu1 %v2599_v29 }
 0xcf7   : > { %3352 = vmatprep.subr.mxu1 %v2598_v30 }
 0xcf8   : > { %3353 = vmatpush3.msra.mxu1 %v2598_v30 }
 0xcf9   : > { %3354 = vmatprep.subr.mxu1 %v2597_v31 }
 0xcfa   : > { %3355 = vmatpush3.msra.mxu1 %v2597_v31  ;;  %v2612_v31 = vsub.s32 5, %v3748_v38 }
 0xcfb   : > { %3356 = vmatprep.subr.mxu1 %v2596_v33 }
 0xcfc   : > { %3357 = vmatpush3.msra.mxu1 %v2596_v33  ;;  %v2613_v33 = vrot.slane %v3756_v40, %v2612_v31 }
 0xcfd   : > { %3358 = vmatprep.subr.mxu1 %v2595_v34 }
 0xcfe   : > { %3359 = vmatpush3.msra.mxu1 %v2595_v34 }
 0xcff   : > { %3360 = vmatprep.subr.mxu1 %v2594_v37 }
 0xd00   : > { %3361 = vmatpush3.msra.mxu1 %v2594_v37 }
 0xda1   : > { %v3318_v43 = vpop.f32.mrf.mxu1 }
 0xda2   : > { %v2403_v46 = vadd.f32 %v3318_v43, %v1985_v16 }
 0xda3   : > { %v2393_v47 = vpop.f32.mrf.mxu1 }
 0xda4   : > { %v2409_v48 = vadd.f32 %v2407_v42, %v2403_v46  ;;  %v2402_v49 = vadd.f32 %v2393_v47, %v1984_v18 }
 0xda6   : > { %v2408_v50 = vadd.f32 %v2407_v42, %v2402_v49  ;;  %v2411_v51 = vadd.f32 %v2409_v48, %v3742_v35 }
 0xda8   : > { %v2415_v52 = vsel %vm619_vm1, %v2411_v51, 0.0  ;;  %v2410_v53 = vadd.f32 %v2408_v50, %v3736_v32 }
 0xda9   : > { %2416 = vadd.xlane.f32.xlu0 %v2415_v52 }
 0xdaa   : > { %v2412_v54 = vsel %vm619_vm1, %v2410_v53, 0.0 }
 0xdab   : > { %2413 = vadd.xlane.f32.xlu1 %v2412_v54 }
 0xe32   : > { %v2417_v55 = vpop.xlane.xlu0 %2416 }
 0xe33   : > { %v2420_v56 = vmul.f32 0.03125, %v2417_v55 }
 0xe34   : > { %v2414_v57 = vpop.xlane.xlu1 %2413 }
 0xe35   : > { %v2422_v59 = vsub.f32 %v2411_v51, %v2420_v56  ;;  %v2419_v60 = vmul.f32 0.03125, %v2414_v57 }
 0xe37   : > { %v2421_v61 = vsub.f32 %v2410_v53, %v2419_v60  ;;  %v2424_v62 = vmul.f32 %v2422_v59, %v2422_v59 }
 0xe39   : > { %v2428_v35 = vsel %vm619_vm1, %v2424_v62, 0.0  ;;  %v2423_v63 = vmul.f32 %v2421_v61, %v2421_v61 }
 0xe3a   : > { %2429 = vadd.xlane.f32.xlu0 %v2428_v35 }
 0xe3b   : > { %v2425_v32 = vsel %vm619_vm1, %v2423_v63, 0.0 }
 0xe3c   : > { %2426 = vadd.xlane.f32.xlu1 %v2425_v32 }
 0xec3   : > { %v2430_v5 = vpop.xlane.xlu0 %2429 }
 0xec4   : > { %v2432_v6 = vmul.f32 0.03125, %v2430_v5 }
 0xec5   : > { %v2427_v58 = vpop.xlane.xlu1 %2426 }
 0xec6   : > { %v2434_v7 = vadd.f32 1e-12, %v2432_v6  ;;  %v2431_v8 = vmul.f32 0.03125, %v2427_v58 }
 0xec8   : > { %3470 = vrsqrt.f32 %v2434_v7  ;;  %v2433_v9 = vadd.f32 1e-12, %v2431_v8 }
 0xeca   : > { %3472 = vrsqrt.f32 %v2433_v9 }
 0xed5   : > { %v3471_v11 = vpop.eup %3470 }
 0xed6   : > { %v2438_v16 = vmul.f32 %v3471_v11, %v2422_v59 }
 0xed7   : > { %v3473_v17 = vpop.eup %3472 }
 0xed8   : > { %v2437_v18 = vmul.f32 %v3473_v17, %v2421_v61  ;;  %v2444_v19 = vmul.f32 %v2442_v12, %v2438_v16 }
 0xeda   : > { %v2443_v20 = vmul.f32 %v2442_v12, %v2437_v18  ;;  %v3929_v22 = vadd.f32 %v2448_v36, %v2444_v19 }
 0xedc   : > { %v3927_v21 = vadd.f32 %v2448_v36, %v2443_v20 }
 0xede   : > { %3327 = vmatprep.mubr.msk.f32.mxu0 %vm619_vm1, %v3927_v21 }
 0xedf   : > { %3328 = vmatmul.mubr.msk.f32.vlgmr.msra.gmra.mxu0 %vm619_vm1, %v3929_v22 }
 0xf9f   : > { %v3329_v45 = vpop.f32.mrf.mxu0 }
 0xfa0   : > { %v2537_v42 = vadd.f32 %v3329_v45, %v2458_v41 }
 0xfa1   : > { %v2531_v43 = vpop.f32.mrf.mxu0 }
 0xfa2   : > { %v2543_v46 = vmul.f32 0.70710677, %v2537_v42  ;;  %v2532_v47 = vadd.f32 %v2531_v43, %v2458_v41  ;;  %v2541_v44 = vmul.f32 0.5, %v2537_v42 }
 0xfa4   : > { %v2545_v48 = vand.u32 2147483647, %v2543_v46  ;;  %v2542_v49 = vmul.f32 0.70710677, %v2532_v47  ;;  %vm2585_vm4 = vcmp.ge.f32.partialorder %v2543_v46, 0.0  ;;  %v2540_v0 = vmul.f32 0.5, %v2532_v47 }
 0xfa6   : > { %v2547_v50 = vmul.f32 0.3275911, %v2545_v48  ;;  %v2544_v51 = vand.u32 2147483647, %v2542_v49  ;;  %v2573_v55 = vsub.f32 0.0, %v2545_v48  ;;  %vm2584_vm5 = vcmp.ge.f32.partialorder %v2542_v49, 0.0 }
 0xfa8   : > { %v2549_v52 = vadd.f32 1.0, %v2547_v50  ;;  %v2546_v53 = vmul.f32 0.3275911, %v2544_v51  ;;  %v2572_v56 = vsub.f32 0.0, %v2544_v51  ;;  %v2575_v57 = vmul.f32 %v2573_v55, %v2545_v48 }
 0xfaa   : > { %3474 = vrcp.f32 %v2549_v52  ;;  %v2548_v54 = vadd.f32 1.0, %v2546_v53  ;;  %v2574_v60 = vmul.f32 %v2572_v56, %v2544_v51  ;;  %v2578_v62 = vmul.f32 1.442695, %v2575_v57 }
 0xfac   : > { %3476 = vrcp.f32 %v2548_v54  ;;  %v2576_v32 = vmul.f32 1.442695, %v2574_v60 }
 0xfad   : > { %3478 = vpow2.f32 %v2578_v62  ;;  %v2725_v62 = vsub.s32 7, %v3748_v38 }
 0xfae   : > { %3480 = vpow2.f32 %v2576_v32 }
 0xfb7   : > { %v3475_v59 = vpop.eup %3474 }
 0xfb8   : > { %v2555_v61 = vmul.f32 1.0614054, %v3475_v59 }
 0xfb9   : > { %v3477_v35 = vpop.eup %3476 }
 0xfba   : > { %v3104_v63 = vadd.f32 -1.4531521, %v2555_v61  ;;  %v2554_v1 = vmul.f32 1.0614054, %v3477_v35  ;;  %v3479_v16 = vpop.eup %3478  ;;  %v2719_v61 = vsub.s32 6, %v3748_v38 }
 0xfbb   : > { %v3481_v36 = vpop.eup %3480 }
 0xfbc   : > { %v2559_v2 = vmul.f32 %v3475_v59, %v3104_v63  ;;  %v3103_v3 = vadd.f32 -1.4531521, %v2554_v1 }
 0xfbe   : > { %v2561_v4 = vadd.f32 1.4214138, %v2559_v2  ;;  %v2558_v5 = vmul.f32 %v3477_v35, %v3103_v3 }
 0xfc0   : > { %v2563_v6 = vmul.f32 %v3475_v59, %v2561_v4  ;;  %v2560_v58 = vadd.f32 1.4214138, %v2558_v5 }
 0xfc2   : > { %v3106_v7 = vadd.f32 -0.28449672, %v2563_v6  ;;  %v2562_v8 = vmul.f32 %v3477_v35, %v2560_v58 }
 0xfc4   : > { %v2567_v9 = vmul.f32 %v3475_v59, %v3106_v7  ;;  %v3105_v10 = vadd.f32 -0.28449672, %v2562_v8 }
 0xfc6   : > { %v2569_v11 = vadd.f32 0.2548296, %v2567_v9  ;;  %v2566_v12 = vmul.f32 %v3477_v35, %v3105_v10 }
 0xfc8   : > { %v2571_v15 = vmul.f32 %v3475_v59, %v2569_v11  ;;  %v2568_v17 = vadd.f32 0.2548296, %v2566_v12 }
 0xfca   : > { %v2581_v18 = vmul.f32 %v3479_v16, %v2571_v15  ;;  %v2570_v19 = vmul.f32 %v3477_v35, %v2568_v17  ;;  %v3486_v35 = vld [vmem:[%s3713_s24] sm:$0xff] }
 0xfcb   : > { %v2720_v63 = vrot.slane %v3486_v35, %v2719_v61  ;;  %v2726_v1 = vrot.slane %v3486_v35, %v2725_v62 }
 0xfcc   : > { %v2583_v20 = vsub.f32 1.0, %v2581_v18  ;;  %v2580_v13 = vmul.f32 %v3481_v36, %v2570_v19 }
 0xfce   : > { %v2587_v23 = vsub.f32 0.0, %v2583_v20  ;;  %v2582_v24 = vsub.f32 1.0, %v2580_v13 }
 0xfd0   : > { %v2589_v14 = vsel %vm2585_vm4, %v2583_v20, %v2587_v23  ;;  %v2586_v25 = vsub.f32 0.0, %v2582_v24 }
 0xfd1   : > { %v2591_v26 = vadd.f32 1.0, %v2589_v14 }
 0xfd2   : > { %v2588_v27 = vsel %vm2584_vm5, %v2582_v24, %v2586_v25 }
 0xfd3   : > { %v2590_v28 = vadd.f32 1.0, %v2588_v27  ;;  %v2593_v30 = vmul.f32 %v2591_v26, %v2541_v44 }
 0xfd5   : > { %v2592_v29 = vmul.f32 %v2590_v28, %v2540_v0 }
 0xfd7   : > { %3362 = vmatprep.mubr.f32.mxu1 %v2592_v29 }
 0xfd8   : > { %3363 = vmatmul.mubr.f32.vlgmr.msra.gmra.mxu1 %v2593_v30 }
0x1098   : > { %v3364_v34 = vpop.f32.mrf.mxu1 }
0x1099   : > { %v2686_v37 = vadd.f32 %v3364_v34, %v2613_v33 }
0x109a   : > { %v2680_v39 = vpop.f32.mrf.mxu1 }
0x109b   : > { %v2681_v41 = vadd.f32 %v2680_v39, %v2613_v33  ;;  %v2690_v45 = vadd.f32 %v2686_v37, %v3929_v22 }
0x109d   : > { %v2694_v43 = vsel %vm619_vm1, %v2690_v45, 0.0  ;;  %v2689_v46 = vadd.f32 %v2681_v41, %v3927_v21 }
0x109e   : > { %2695 = vadd.xlane.f32.xlu0 %v2694_v43 }
0x109f   : > { %v2691_v42 = vsel %vm619_vm1, %v2689_v46, 0.0 }
0x10a0   : > { %2692 = vadd.xlane.f32.xlu1 %v2691_v42 }
0x1127   : > { %v2696_v47 = vpop.xlane.xlu0 %2695 }
0x1128   : > { %v2698_v48 = vmul.f32 0.03125, %v2696_v47 }
0x1129   : > { %v2693_v49 = vpop.xlane.xlu1 %2692 }
0x112a   : > { %v2700_v50 = vsub.f32 %v2690_v45, %v2698_v48  ;;  %v2697_v51 = vmul.f32 0.03125, %v2693_v49 }
0x112c   : > { %v2699_v40 = vsub.f32 %v2689_v46, %v2697_v51  ;;  %v2702_v52 = vmul.f32 %v2700_v50, %v2700_v50 }
0x112e   : > { %v2706_v53 = vsel %vm619_vm1, %v2702_v52, 0.0  ;;  %v2701_v54 = vmul.f32 %v2699_v40, %v2699_v40 }
0x112f   : > { %2707 = vadd.xlane.f32.xlu0 %v2706_v53 }
0x1130   : > { %v2703_v22 = vsel %vm619_vm1, %v2701_v54, 0.0 }
0x1131   : > { %2704 = vadd.xlane.f32.xlu1 %v2703_v22 }
0x11b8   : > { %v2708_v21 = vpop.xlane.xlu0 %2707 }
0x11b9   : > { %v2710_v55 = vmul.f32 0.03125, %v2708_v21 }
0x11ba   : > { %v2705_v56 = vpop.xlane.xlu1 %2704 }
0x11bb   : > { %v2712_v57 = vadd.f32 1e-12, %v2710_v55  ;;  %v2709_v59 = vmul.f32 0.03125, %v2705_v56 }
0x11bd   : > { %3482 = vrsqrt.f32 %v2712_v57  ;;  %v2711_v60 = vadd.f32 1e-12, %v2709_v59 }
0x11bf   : > { %3484 = vrsqrt.f32 %v2711_v60 }
0x11ca   : > { %v3483_v32 = vpop.eup %3482 }
0x11cb   : > { %v2716_v2 = vmul.f32 %v3483_v32, %v2700_v50 }
0x11cc   : > { %v3485_v3 = vpop.eup %3484 }
0x11cd   : > { %v2722_v4 = vmul.f32 %v2720_v63, %v2716_v2  ;;  %v2715_v5 = vmul.f32 %v3485_v3, %v2699_v40 }
0x11cf   : > { %v2728_v6 = vadd.f32 %v2726_v1, %v2722_v4  ;;  %v2721_v58 = vmul.f32 %v2720_v63, %v2715_v5  ;;  %2734 = sbr.rel (%p3107_p5) target bundleno = 4978 (0x1372), region = 80 }
0x11d1   : > { %2730 = vst.msk [vmem:[#allocation2 + $0x8] sm:$0xff] %vm619_vm1, %v2728_v6  ;;  %v2727_v7 = vadd.f32 %v2726_v1, %v2721_v58 }
0x11d3   : > { %2729 = vst.msk [vmem:[#allocation2] sm:$0xff] %vm619_vm1, %v2727_v7 }
0x11d4   : > { %v2738_v38 = vld [vmem:[%s4041_s9 + $0x18] sm:$0xff]  ;;  %v3591_v8 = vmov 0.0   ;;  %v2737_v9 = vld [vmem:[%s4041_s9 + $0x10] sm:$0xff]  ;;  %vm3592_vm6 = vmmov 0   ;;  %v2748_v10 = vrot.slane %v2728_v6, 7  ;;  %v2736_v11 = vld [vmem:[%s4041_s9 + $0x8] sm:$0xff] }
0x11d5   : > { %3365 = vmatprep.subr.mxu0 %v3591_v8  ;;  %3373 = vmatprep.mubr.msk.f32.mxu0 %vm3592_vm6, %v3591_v8  ;;  %vm2749_vm7 = vcmask 1041409   ;;  %v2735_v12 = vld [vmem:[%s4041_s9] sm:$0xff]  ;;  %v2829_v16 = vld [vmem:[%s4043_s11 + $0x18] sm:$0xff]  ;;  %v2828_v17 = vld [vmem:[%s4043_s11 + $0x10] sm:$0xff]  ;;  %vm2824_vm8 = vcmask 254976   ;;  %vm2910_vm9 = vcmask 17408  }
0x11d6   : > { %3366 = vmatpush3.msra.mxu0 %v2738_v38  ;;  %3376 = vmatprep.subr.mxu1 %v3591_v8  ;;  %v2750_v15 = vsel %vm2749_vm7, %v2748_v10, %v2727_v7  ;;  %v2827_v18 = vld [vmem:[%s4043_s11 + $0x8] sm:$0xff]  ;;  %v2826_v19 = vld [vmem:[%s4043_s11] sm:$0xff] }
0x11d7   : > { %3367 = vmatprep.subr.mxu0 %v3591_v8  ;;  %3384 = vmatprep.mubr.msk.f32.mxu1 %vm3592_vm6, %v3591_v8  ;;  %v3108_v36 = vld [vmem:[%s4042_s10] ss:$0 sm:$0xff] }
0x11d8   : > { %3368 = vmatpush3.msra.mxu0 %v2737_v9  ;;  %3377 = vmatpush3.msra.mxu1 %v2829_v16  ;;  %v3110_v14 = vld [vmem:[%s4044_s12] ss:$0 sm:$0xff] }
0x11d9   : > { %3369 = vmatprep.subr.mxu0 %v3591_v8  ;;  %3378 = vmatprep.subr.mxu1 %v3591_v8 }
0x11da   : > { %3370 = vmatpush3.msra.mxu0 %v2736_v11  ;;  %3379 = vmatpush3.msra.mxu1 %v2828_v17 }
0x11db   : > { %3371 = vmatprep.subr.mxu0 %v3591_v8  ;;  %3380 = vmatprep.subr.mxu1 %v3591_v8 }
0x11dc   : > { %3372 = vmatpush3.msra.mxu0 %v2735_v12  ;;  %3381 = vmatpush3.msra.mxu1 %v2827_v18 }
0x11dd   : > { %3374 = vmatmul.mubr.msk.f32.vlgmr.msra.gmra.mxu0 %vm619_vm1, %v2750_v15  ;;  %3382 = vmatprep.subr.mxu1 %v3591_v8 }
0x11de   : > { %3383 = vmatpush3.msra.mxu1 %v2826_v19 }
0x129d   : > { %v2819_v20 = vpop.f32.mrf.mxu0 }
0x129e   : > { %v2820_v13 = vadd.f32 %v3108_v36, %v2819_v20 }
0x129f   : > { %v3375_v23 = vpop.f32.mrf.mxu0 }
0x12a0   : > { %3487 = vtanh.f32 %v2820_v13 }
0x12ad   : > { %v3488_v24 = vpop.eup %3487 }
0x12ae   : > { %2825 = vst.msk [vmem:[#allocation4] sm:$0x3] %vm2824_vm8, %v3488_v24  ;;  %3385 = vmatmul.mubr.msk.f32.vlgmr.msra.gmra.mxu1 %vm619_vm1, %v3488_v24 }
0x136e   : > { %v2906_v25 = vpop.f32.mrf.mxu1 }
0x136f   : > { %v2907_v26 = vadd.f32 %v3110_v14, %v2906_v25 }
0x1370   : > { %v3386_v27 = vpop.f32.mrf.mxu1 }
0x1371   : > { %2911 = vst.msk [vmem:[#allocation6] sm:$0x3] %vm2910_vm9, %v2907_v26 }
0x1372 PF: > { %p3399_p6 = scmp.eq.s32.totalorder %s3684_s19, 1  ;;  %s3593_s24 = smov [#allocation4]  }
0x1373   : > { %s2932_s22 = sshll.u32 %s3593_s24, 4  ;;  %s3594_s25 = smov [#allocation2]   ;;  %s2933_s22 = int_to_ptr.vmem [resolvable:$true] %s2932_s22 }
0x1374   : > { %s2918_s30 = sshll.u32 %s3594_s25, 4  ;;  %s3489_s17 = scalar_lea.vmem %s2933_s22, 32  ;;  %s2919_s30 = int_to_ptr.vmem [resolvable:$true] %s2918_s30 }
0x1375   : > { %p3490_p7 = scmp.ne.s32.totalorder %s2933_s22, %s3489_s17  ;;  %p3496_p10 = scmp.lt.s32.totalorder %s2933_s22, %s2933_s22 }
0x1376   : > { %p3497_p11 = scmp.lt.s32.totalorder %s3489_s17, %s3489_s17 }
0x1377   : > { %p3491_p8 = pnand %p3490_p7, %p3399_p6 }
0x1378   : > { %p3498_p12 = por %p3497_p11, %p3496_p10 }
0x1379   : > { %p3492_p9 = pneg %p3491_p8 }
0x137b   : > { %p3499_p13 = pnand %p3498_p12, %p3492_p9 }
0x137d   : > { %3502 = shalt.err (!%p3499_p13)
}
0x137e   : > { %s4053_s27 = sld [smem:[#allocation11_spill]]  ;;  %s3513_s21 = scalar_lea.vmem %s2919_s30, 256 }
0x137f   : > { %p3514_p0 = scmp.ne.s32.totalorder %s2919_s30, %s3513_s21  ;;  %p3520_p3 = scmp.lt.s32.totalorder %s2919_s30, %s2919_s30 }
0x1380   : > { %p3521_p4 = scmp.lt.s32.totalorder %s3513_s21, %s3513_s21 }
0x1381   : > { %p3515_p1 = pnand %p3514_p0, %p3399_p6 }
0x1382   : > { %p3522_p5 = por %p3521_p4, %p3520_p3 }
0x1383   : > { %p3516_p2 = pneg %p3515_p1 }
0x1384   : > { %3390 = dma.vmem_to_hbm [thread:$0]  (%p3399_p6), %s2933_s22, 32, %s4053_s27, [#allocation5]  }
0x1385   : > { %p3523_p7 = pnand %p3522_p5, %p3516_p2 }
0x1387   : > { %3526 = shalt.err (!%p3523_p7)
}
0x1388   : > { %s3595_s29 = smov 128   ;;  %s3596_s13 = smov 8  }
0x1389   : > { %s4054_s20 = sld [smem:[#allocation10_spill]]  ;;  %s3597_s15 = smov [#allocation6]  }
0x138a   : > { %s2943_s28 = sshll.u32 %s3597_s15, 4  ;;  %s2944_s28 = int_to_ptr.vmem [resolvable:$true] %s2943_s28 }
0x138b   : > { %s3537_s16 = scalar_lea.vmem %s2944_s28, 32  ;;  %p3544_p11 = scmp.lt.s32.totalorder %s2944_s28, %s2944_s28 }
0x138c   : > { %p3538_p8 = scmp.ne.s32.totalorder %s2944_s28, %s3537_s16  ;;  %p3545_p12 = scmp.lt.s32.totalorder %s3537_s16, %s3537_s16 }
0x138e   : > { %p3539_p9 = pnand %p3538_p8, %p3399_p6  ;;  %p3546_p13 = por %p3545_p12, %p3544_p11 }
0x138f   : > { %3388 = dma.vmem_to_hbm [thread:$0]  (%p3399_p6), %s2919_s30, 256, %s4054_s20, [#allocation3], %s3595_s29, %s3595_s29, %s3596_s13  }
0x1390   : > { %p3540_p10 = pneg %p3539_p9 }
0x1392   : > { %p3547_p0 = pnand %p3546_p13, %p3540_p10 }
0x1394   : > { %3550 = shalt.err (!%p3547_p0)
}
0x1395   : > { %s4055_s25 = sld [smem:[#allocation12_spill]] }
0x139b   : > { %3392 = dma.vmem_to_hbm [thread:$0]  (%p3399_p6), %s2944_s28, 32, %s4055_s25, [#allocation5]  }
0x139c   : > { %3566 = dma.done.wait (%p3399_p6), [#allocation3], 256  }
0x139d   : > { %3568 = vsyncadd (%p3399_p6), [#allocation3], 4294967040 }
0x139e   : > { %3570 = dma.done.wait (%p3399_p6), [#allocation5], 64  }
0x139f   : > { %3572 = vsyncadd (%p3399_p6), [#allocation5], 4294967232 }
0x13a0 PF: > { %s4056_s30 = sld [smem:[#allocation9_spill]] }
0x13a6   : > { %s28_s18 = sadd.s32 1, %s4056_s30  }
0x13a7   : > { %p25_p1 = scmp.ge.s32.totalorder %s28_s18, 4  }
0x13a9   :  { %27 = sbr.rel (!%p25_p1) target bundleno = 6 (0x6), region = 135 }
0x13ae   :  { %2964 = vsyncpa [#allocation3], 1 }
0x13af   :  { %2966 = vsyncpa [#allocation3 + $0x1], 1 }
0x13b0   :  { %2967 = vsyncpa [#allocation5], 1 }

</bundles_post_ra>
